<compile_context>
chip_gen: v7x
topology: tpu7x:2x2x1
jax: 0.10.0
libtpu: 0.0.40
codegen_flags: <defaults>
</compile_context>

<pallas_src>
import functools

import jax
import jax.numpy as jnp
from jax.experimental import pallas as pl
from jax.experimental.pallas import tpu as pltpu


def _selection_kernel(emb_ref, vmask_ref, wih_ref, whhf_ref, whhb_ref, bias_ref,
                      wfc_ref, out_ref, gxf_ref, gxb_ref, ofwd_ref, obwd_ref, *, B, L):
    H = whhf_ref.shape[0]
    R = wfc_ref.shape[1]

    # loop-invariant weights, loaded once (8 vregs for both directions)
    whh_f = whhf_ref[...]                         # (H, 3H), gate order [r|z|n]
    whh_b = whhb_ref[...]
    bhn_f = bias_ref[:, 6 * H:7 * H]              # (1, H)
    bhn_b = bias_ref[:, 7 * H:8 * H]

    # ---- fused hoisted input projection for both directions: one (L*B,E)x(E,6H) dot.
    # b_ih (all gates) and b_hh[r,z] are pre-folded into bias_ref[:, :6H].
    gx = jnp.dot(emb_ref[...], wih_ref[...], preferred_element_type=jnp.float32)
    gx = gx + bias_ref[:, 0:6 * H]
    # one-time direction split, streamed to VMEM scratch so it is not held live in vregs
    gxf_ref[...] = gx[:, 0:3 * H]
    gxb_ref[...] = gx[:, 3 * H:6 * H]

    h_f = jnp.zeros((B, H), jnp.float32)
    h_b = jnp.zeros((B, H), jnp.float32)
    feat = jnp.full((B, H), -jnp.inf, jnp.float32)

    # ---- interleaved fwd/bwd recurrence, fully unrolled (L tiny & static).
    # One fused (B,H)x(H,3H) dot per direction per step.  Hidden state is frozen on
    # <pad> rows (exact pack_padded_sequence emulation because h0 == 0).
    # Pooling is folded into the second half of the loop: at step t >= L/2 both
    # members of time pairs `t` and `L-1-t` are available (first-half outputs are
    # streamed to VMEM scratch), so no epilogue pass and no 2L live outputs.
    for t in range(L):
        tb = L - 1 - t
        rf = slice(t * B, (t + 1) * B)            # sublane-aligned row blocks (B == 8)
        rb = slice(tb * B, (tb + 1) * B)
        v_f = vmask_ref[rf, :]                    # (B, 1): 1 = real token, 0 = <pad>
        v_b = vmask_ref[rb, :]
        gx_f = gxf_ref[rf, :]                     # (B, 3H)
        gx_b = gxb_ref[rb, :]

        gh_f = jnp.dot(h_f, whh_f, preferred_element_type=jnp.float32)   # (B, 3H)
        gh_b = jnp.dot(h_b, whh_b, preferred_element_type=jnp.float32)

        rz_f = jax.nn.sigmoid(gx_f[:, 0:2 * H] + gh_f[:, 0:2 * H])
        n_f = jnp.tanh(gx_f[:, 2 * H:] + rz_f[:, 0:H] * (gh_f[:, 2 * H:] + bhn_f))
        h_f = h_f + v_f * (1.0 - rz_f[:, H:2 * H]) * (n_f - h_f)

        rz_b = jax.nn.sigmoid(gx_b[:, 0:2 * H] + gh_b[:, 0:2 * H])
        n_b = jnp.tanh(gx_b[:, 2 * H:] + rz_b[:, 0:H] * (gh_b[:, 2 * H:] + bhn_b))
        h_b = h_b + v_b * (1.0 - rz_b[:, H:2 * H]) * (n_b - h_b)

        if t < tb:
            # first half: stash the outputs the second-half pooling will need
            ofwd_ref[rf, :] = h_f
            obwd_ref[rb, :] = h_b
        elif t == tb:
            # odd-L middle step: both members of pair `t` are in registers
            o_s = 0.5 * (h_f + h_b)
            feat = jnp.maximum(feat, jnp.where(v_f > 0.0, o_s, -jnp.inf))
        else:
            # pair `t`:  fwd output just computed, bwd output streamed at step L-1-t
            o_t = 0.5 * (h_f + obwd_ref[rf, :])
            feat = jnp.maximum(feat, jnp.where(v_f > 0.0, o_t, -jnp.inf))
            # pair `tb`: bwd output just computed, fwd output streamed at step tb
            o_tb = 0.5 * (ofwd_ref[rb, :] + h_b)
            feat = jnp.maximum(feat, jnp.where(v_b > 0.0, o_tb, -jnp.inf))

    # ---- fc head (dropout_c is identity at inference); w_fc pre-transposed to (H, R)
    out_ref[...] = (jnp.dot(feat, wfc_ref[...], preferred_element_type=jnp.float32)
                    + bias_ref[:, 8 * H:8 * H + R])


@jax.jit
def run_selection(emb, valid, params):
    # emb: (B, L, E) f32 ; valid: (B, L) f32 (1 = real token, 0 = <pad>)
    # NOTE: everything below is traced into the same jit as the pallas_call so the
    # wrapper does not add standalone XLA dispatches.  In a real model the weight-only
    # prep (transposes / folds / concats) should be cached per weight update.
    B, L, E = emb.shape
    H = params['w_hh_f'].shape[1]
    R = params['w_fc'].shape[0]

    # time-major 2-D views: every in-kernel per-step access is an aligned row block
    emb_tm = jnp.transpose(emb, (1, 0, 2)).reshape(L * B, E)
    vmask = valid.T.reshape(L * B, 1).astype(jnp.float32)

    def prep(w_ih, w_hh, b_ih, b_hh):
        # MXU-canonical layouts: (E,3H) input weights, one fused (H,3H) recurrent matrix
        w_ih_t = w_ih.T                                    # (E, 3H)
        w_hh_t = w_hh.T                                    # (H, 3H), gates [r|z|n]
        b_ih = b_ih.reshape(1, 3 * H)
        b_hh = b_hh.reshape(1, 3 * H)
        # fold b_ih (all gates) + b_hh[r,z] into the hoisted projection bias;
        # b_hh_n stays separate (the n gate needs r * (W_hn h + b_hn)).
        bx = b_ih + jnp.concatenate(
            [b_hh[:, :2 * H], jnp.zeros((1, H), jnp.float32)], axis=1)
        bhn = b_hh[:, 2 * H:3 * H]
        return w_ih_t, w_hh_t, bx, bhn

    wih_f, whh_f, bx_f, bhn_f = prep(params['w_ih_f'], params['w_hh_f'],
                                     params['b_ih_f'], params['b_hh_f'])
    wih_b, whh_b, bx_b, bhn_b = prep(params['w_ih_b'], params['w_hh_b'],
                                     params['b_ih_b'], params['b_hh_b'])
    wih_cat = jnp.concatenate([wih_f, wih_b], axis=1)       # (E, 6H) fused projection
    w_fc_t = params['w_fc'].T                               # (H, R)
    # single packed bias vector: [bx_f | bx_b | bhn_f | bhn_b | b_fc]
    bias_cat = jnp.concatenate(
        [bx_f, bx_b, bhn_f, bhn_b, params['b_fc'].reshape(1, R)], axis=1)

    args = (emb_tm, vmask, wih_cat, whh_f, whh_b, bias_cat, w_fc_t)
    return pl.pallas_call(
        functools.partial(_selection_kernel, B=B, L=L),
        out_shape=jax.ShapeDtypeStruct((B, R), jnp.float32),
        in_specs=[pl.BlockSpec(memory_space=pltpu.MemorySpace.VMEM)] * len(args),
        out_specs=pl.BlockSpec(memory_space=pltpu.MemorySpace.VMEM),
        scratch_shapes=[
            pltpu.VMEM((L * B, 3 * H), jnp.float32),   # streamed gx, fwd direction
            pltpu.VMEM((L * B, 3 * H), jnp.float32),   # streamed gx, bwd direction
            pltpu.VMEM((L * B, H), jnp.float32),       # o_fwd stash (first half of steps)
            pltpu.VMEM((L * B, H), jnp.float32),       # o_bwd stash
        ],
        # TODO(synk): if B/L/E grow, add a grid over time blocks with BlockSpec
        #             pipelining and size blocks from pltpu.get_tpu_info() (v7x has
        #             half the VMEM of v5e/v6e).
    )(*args)


# ---------------------------------------------------------------------------
# Pure-JAX reference (PyTorch GRU math, original weight layout) for validation.
# ---------------------------------------------------------------------------
def _gru_cell(x_t, h_prev, w_ih, w_hh, b_ih, b_hh, H):
    gx = jnp.dot(x_t, w_ih.T, preferred_element_type=jnp.float32) + b_ih      # (B, 3H)
    gh = jnp.dot(h_prev, w_hh.T, preferred_element_type=jnp.float32) + b_hh   # (B, 3H)
    r = jax.nn.sigmoid(gx[:, 0 * H:1 * H] + gh[:, 0 * H:1 * H])
    z = jax.nn.sigmoid(gx[:, 1 * H:2 * H] + gh[:, 1 * H:2 * H])
    n = jnp.tanh(gx[:, 2 * H:3 * H] + r * gh[:, 2 * H:3 * H])
    return (1.0 - z) * n + z * h_prev


def reference(emb, valid, p):
    B, L, _ = emb.shape
    H = p['w_hh_f'].shape[1]
    h = jnp.zeros((B, H), jnp.float32)
    o_fwd = []
    for t in range(L):
        v = valid[:, t:t + 1]
        h = v * _gru_cell(emb[:, t, :], h, p['w_ih_f'], p['w_hh_f'],
                          p['b_ih_f'], p['b_hh_f'], H) + (1.0 - v) * h
        o_fwd.append(h)
    h = jnp.zeros((B, H), jnp.float32)
    feat = jnp.full((B, H), -jnp.inf, jnp.float32)
    for t in range(L - 1, -1, -1):
        v = valid[:, t:t + 1]
        h = v * _gru_cell(emb[:, t, :], h, p['w_ih_b'], p['w_hh_b'],
                          p['b_ih_b'], p['b_hh_b'], H) + (1.0 - v) * h
        o = jnp.where(v > 0.0, 0.5 * (o_fwd[t] + h), -jnp.inf)
        feat = jnp.maximum(feat, o)
    return feat @ p['w_fc'].T + p['b_fc']


if __name__ == "__main__":
    B, L = 8, 8                  # batch (fills all 8 f32 sublanes), padded seq length
    E, H = 32, 32                # hyper.emb_size, hyper.hidden_size
    VOCAB, R = 50, 8             # |word_vocab|, |relation_vocab|
    PAD = 0                      # word_vocab['<pad>']

    key = jax.random.PRNGKey(0)
    ks = jax.random.split(key, 12)
    s = 1.0 / (H ** 0.5)

    def u(k, shape, scale):
        return jax.random.uniform(k, shape, jnp.float32, -scale, scale)

    params = dict(
        emb_table=0.1 * jax.random.normal(ks[0], (VOCAB, E), jnp.float32),
        # bidirectional GRU (forward / backward directions), PyTorch layout
        w_ih_f=u(ks[1], (3 * H, E), s), w_hh_f=u(ks[2], (3 * H, H), s),
        b_ih_f=u(ks[3], (1, 3 * H), s), b_hh_f=u(ks[4], (1, 3 * H), s),
        w_ih_b=u(ks[5], (3 * H, E), s), w_hh_b=u(ks[6], (3 * H, H), s),
        b_ih_b=u(ks[7], (1, 3 * H), s), b_hh_b=u(ks[8], (1, 3 * H), s),
        # fc: hidden_size -> |relation_vocab|
        w_fc=u(ks[9], (R, H), s), b_fc=u(ks[10], (1, R), s),
    )

    # sorted-descending lengths (pack_padded_sequence requirement), all >= 1
    lengths = jnp.array([8, 8, 7, 6, 5, 4, 3, 2], dtype=jnp.int32)
    tok = jax.random.randint(ks[11], (B, L), 1, VOCAB)
    pos = jnp.arange(L)[None, :]
    tokens = jnp.where(pos < lengths[:, None], tok, PAD).astype(jnp.int32)   # (B, L)

    mask = tokens == PAD
    valid = (~mask).astype(jnp.float32)                                      # (B, L)
    emb = params['emb_table'][tokens]            # (B, L, E); input_dropout identity at eval

    out = jax.block_until_ready(run_selection(emb, valid, params))           # (B, R)
    ref = reference(emb, valid, params)
    assert out.shape == (B, R)
    assert jnp.allclose(out, ref, atol=5e-4, rtol=5e-4)
    print("KERNEL_OK")
</pallas_src>

<mosaic_0001>
module attributes {stable_mosaic.version = 11 : i64} {
  func.func @_selection_kernel(%arg0: memref<64x32xf32, #tpu.memory_space<vmem>>, %arg1: memref<64x1xf32, #tpu.memory_space<vmem>>, %arg2: memref<32x192xf32, #tpu.memory_space<vmem>>, %arg3: memref<32x96xf32, #tpu.memory_space<vmem>>, %arg4: memref<32x96xf32, #tpu.memory_space<vmem>>, %arg5: memref<1x264xf32, #tpu.memory_space<vmem>>, %arg6: memref<32x8xf32, #tpu.memory_space<vmem>>, %arg7: memref<8x8xf32, #tpu.memory_space<vmem>>, %arg8: memref<64x96xf32, #tpu.memory_space<vmem>>, %arg9: memref<64x96xf32, #tpu.memory_space<vmem>>, %arg10: memref<64x32xf32, #tpu.memory_space<vmem>>, %arg11: memref<64x32xf32, #tpu.memory_space<vmem>>) attributes {dimension_semantics = [], scalar_prefetch = 0 : i64, scratch_operands = 4 : i64, tpu.core_type = #tpu.core_type<tc>} {
    %c0 = arith.constant 0 : index
    %c0_0 = arith.constant 0 : index
    %0 = vector.load %arg3[%c0, %c0_0] : memref<32x96xf32, #tpu.memory_space<vmem>>, vector<32x96xf32>
    %c0_1 = arith.constant 0 : index
    %c0_2 = arith.constant 0 : index
    %1 = vector.load %arg4[%c0_1, %c0_2] : memref<32x96xf32, #tpu.memory_space<vmem>>, vector<32x96xf32>
    %c0_3 = arith.constant 0 : index
    %c192 = arith.constant 192 : index
    %2 = vector.load %arg5[%c0_3, %c192] : memref<1x264xf32, #tpu.memory_space<vmem>>, vector<1x32xf32>
    %c0_4 = arith.constant 0 : index
    %c224 = arith.constant 224 : index
    %3 = vector.load %arg5[%c0_4, %c224] : memref<1x264xf32, #tpu.memory_space<vmem>>, vector<1x32xf32>
    %c0_5 = arith.constant 0 : index
    %c0_6 = arith.constant 0 : index
    %4 = vector.load %arg0[%c0_5, %c0_6] : memref<64x32xf32, #tpu.memory_space<vmem>>, vector<64x32xf32>
    %c0_7 = arith.constant 0 : index
    %c0_8 = arith.constant 0 : index
    %5 = vector.load %arg2[%c0_7, %c0_8] : memref<32x192xf32, #tpu.memory_space<vmem>>, vector<32x192xf32>
    %cst = arith.constant dense<0.000000e+00> : vector<64x192xf32>
    %6 = tpu.matmul %4, %5, %cst {dimension_numbers = #tpu.dot_dimension_numbers<[1], [0], [0], [1], [0, 0, 1, 1], [], []>} : vector<64x32xf32>, vector<32x192xf32>, vector<64x192xf32> -> vector<64x192xf32>
    %c0_9 = arith.constant 0 : index
    %c0_10 = arith.constant 0 : index
    %7 = vector.load %arg5[%c0_9, %c0_10] : memref<1x264xf32, #tpu.memory_space<vmem>>, vector<1x192xf32>
    %8 = vector.broadcast %7 : vector<1x192xf32> to vector<64x192xf32>
    %9 = arith.addf %6, %8 : vector<64x192xf32>
    %10 = vector.extract_strided_slice %9 {offsets = [0, 0], sizes = [64, 96], strides = [1, 1]} : vector<64x192xf32> to vector<64x96xf32>
    %c0_11 = arith.constant 0 : index
    %c0_12 = arith.constant 0 : index
    %11 = vector.load %arg8[%c0_11, %c0_12] : memref<64x96xf32, #tpu.memory_space<vmem>>, vector<64x96xf32>
    tpu.vector_store %arg8[%c0_11, %c0_12], %10 {strides = array<i32>} : memref<64x96xf32, #tpu.memory_space<vmem>>, vector<64x96xf32>,
    %12 = vector.extract_strided_slice %9 {offsets = [0, 96], sizes = [64, 96], strides = [1, 1]} : vector<64x192xf32> to vector<64x96xf32>
    %c0_13 = arith.constant 0 : index
    %c0_14 = arith.constant 0 : index
    %13 = vector.load %arg9[%c0_13, %c0_14] : memref<64x96xf32, #tpu.memory_space<vmem>>, vector<64x96xf32>
    tpu.vector_store %arg9[%c0_13, %c0_14], %12 {strides = array<i32>} : memref<64x96xf32, #tpu.memory_space<vmem>>, vector<64x96xf32>,
    %cst_15 = arith.constant 0.000000e+00 : f32
    %14 = vector.broadcast %cst_15 : f32 to vector<8x32xf32>
    %cst_16 = arith.constant 0.000000e+00 : f32
    %15 = vector.broadcast %cst_16 : f32 to vector<8x32xf32>
    %cst_17 = arith.constant 0xFF800000 : f32
    %16 = vector.broadcast %cst_17 : f32 to vector<8x32xf32>
    %c0_18 = arith.constant 0 : index
    %c0_19 = arith.constant 0 : index
    %17 = vector.load %arg1[%c0_18, %c0_19] : memref<64x1xf32, #tpu.memory_space<vmem>>, vector<8x1xf32>
    %c56 = arith.constant 56 : index
    %c0_20 = arith.constant 0 : index
    %18 = vector.load %arg1[%c56, %c0_20] : memref<64x1xf32, #tpu.memory_space<vmem>>, vector<8x1xf32>
    %c0_21 = arith.constant 0 : index
    %c0_22 = arith.constant 0 : index
    %19 = vector.load %arg8[%c0_21, %c0_22] : memref<64x96xf32, #tpu.memory_space<vmem>>, vector<8x96xf32>
    %c56_23 = arith.constant 56 : index
    %c0_24 = arith.constant 0 : index
    %20 = vector.load %arg9[%c56_23, %c0_24] : memref<64x96xf32, #tpu.memory_space<vmem>>, vector<8x96xf32>
    %cst_25 = arith.constant dense<0.000000e+00> : vector<8x96xf32>
    %21 = tpu.matmul %14, %0, %cst_25 {dimension_numbers = #tpu.dot_dimension_numbers<[1], [0], [0], [1], [0, 0, 1, 1], [], []>} : vector<8x32xf32>, vector<32x96xf32>, vector<8x96xf32> -> vector<8x96xf32>
    %cst_26 = arith.constant dense<0.000000e+00> : vector<8x96xf32>
    %22 = tpu.matmul %15, %1, %cst_26 {dimension_numbers = #tpu.dot_dimension_numbers<[1], [0], [0], [1], [0, 0, 1, 1], [], []>} : vector<8x32xf32>, vector<32x96xf32>, vector<8x96xf32> -> vector<8x96xf32>
    %23 = vector.extract_strided_slice %19 {offsets = [0, 0], sizes = [8, 64], strides = [1, 1]} : vector<8x96xf32> to vector<8x64xf32>
    %24 = vector.extract_strided_slice %21 {offsets = [0, 0], sizes = [8, 64], strides = [1, 1]} : vector<8x96xf32> to vector<8x64xf32>
    %25 = arith.addf %23, %24 : vector<8x64xf32>
    %26 = arith.negf %25 : vector<8x64xf32>
    %27 = math.exp %26 : vector<8x64xf32>
    %cst_27 = arith.constant 1.000000e+00 : f32
    %28 = vector.broadcast %cst_27 : f32 to vector<8x64xf32>
    %29 = arith.addf %28, %27 : vector<8x64xf32>
    %30 = arith.divf %28, %29 : vector<8x64xf32>
    %31 = vector.extract_strided_slice %19 {offsets = [0, 64], sizes = [8, 32], strides = [1, 1]} : vector<8x96xf32> to vector<8x32xf32>
    %32 = vector.extract_strided_slice %30 {offsets = [0, 0], sizes = [8, 32], strides = [1, 1]} : vector<8x64xf32> to vector<8x32xf32>
    %33 = vector.extract_strided_slice %21 {offsets = [0, 64], sizes = [8, 32], strides = [1, 1]} : vector<8x96xf32> to vector<8x32xf32>
    %34 = vector.broadcast %2 : vector<1x32xf32> to vector<8x32xf32>
    %35 = arith.addf %33, %34 : vector<8x32xf32>
    %36 = arith.mulf %32, %35 : vector<8x32xf32>
    %37 = arith.addf %31, %36 : vector<8x32xf32>
    %38 = math.tanh %37 : vector<8x32xf32>
    %39 = vector.extract_strided_slice %30 {offsets = [0, 32], sizes = [8, 32], strides = [1, 1]} : vector<8x64xf32> to vector<8x32xf32>
    %cst_28 = arith.constant 1.000000e+00 : f32
    %40 = vector.broadcast %cst_28 : f32 to vector<8x32xf32>
    %41 = arith.subf %40, %39 : vector<8x32xf32>
    %42 = vector.broadcast %17 : vector<8x1xf32> to vector<8x32xf32>
    %43 = arith.mulf %42, %41 : vector<8x32xf32>
    %44 = arith.subf %38, %14 : vector<8x32xf32>
    %45 = arith.mulf %43, %44 : vector<8x32xf32>
    %46 = arith.addf %14, %45 : vector<8x32xf32>
    %47 = vector.extract_strided_slice %20 {offsets = [0, 0], sizes = [8, 64], strides = [1, 1]} : vector<8x96xf32> to vector<8x64xf32>
    %48 = vector.extract_strided_slice %22 {offsets = [0, 0], sizes = [8, 64], strides = [1, 1]} : vector<8x96xf32> to vector<8x64xf32>
    %49 = arith.addf %47, %48 : vector<8x64xf32>
    %50 = arith.negf %49 : vector<8x64xf32>
    %51 = math.exp %50 : vector<8x64xf32>
    %cst_29 = arith.constant 1.000000e+00 : f32
    %52 = vector.broadcast %cst_29 : f32 to vector<8x64xf32>
    %53 = arith.addf %52, %51 : vector<8x64xf32>
    %54 = arith.divf %52, %53 : vector<8x64xf32>
    %55 = vector.extract_strided_slice %20 {offsets = [0, 64], sizes = [8, 32], strides = [1, 1]} : vector<8x96xf32> to vector<8x32xf32>
    %56 = vector.extract_strided_slice %54 {offsets = [0, 0], sizes = [8, 32], strides = [1, 1]} : vector<8x64xf32> to vector<8x32xf32>
    %57 = vector.extract_strided_slice %22 {offsets = [0, 64], sizes = [8, 32], strides = [1, 1]} : vector<8x96xf32> to vector<8x32xf32>
    %58 = vector.broadcast %3 : vector<1x32xf32> to vector<8x32xf32>
    %59 = arith.addf %57, %58 : vector<8x32xf32>
    %60 = arith.mulf %56, %59 : vector<8x32xf32>
    %61 = arith.addf %55, %60 : vector<8x32xf32>
    %62 = math.tanh %61 : vector<8x32xf32>
    %63 = vector.extract_strided_slice %54 {offsets = [0, 32], sizes = [8, 32], strides = [1, 1]} : vector<8x64xf32> to vector<8x32xf32>
    %cst_30 = arith.constant 1.000000e+00 : f32
    %64 = vector.broadcast %cst_30 : f32 to vector<8x32xf32>
    %65 = arith.subf %64, %63 : vector<8x32xf32>
    %66 = vector.broadcast %18 : vector<8x1xf32> to vector<8x32xf32>
    %67 = arith.mulf %66, %65 : vector<8x32xf32>
    %68 = arith.subf %62, %15 : vector<8x32xf32>
    %69 = arith.mulf %67, %68 : vector<8x32xf32>
    %70 = arith.addf %15, %69 : vector<8x32xf32>
    %c0_31 = arith.constant 0 : index
    %c0_32 = arith.constant 0 : index
    %71 = vector.load %arg10[%c0_31, %c0_32] : memref<64x32xf32, #tpu.memory_space<vmem>>, vector<8x32xf32>
    tpu.vector_store %arg10[%c0_31, %c0_32], %46 {strides = array<i32>} : memref<64x32xf32, #tpu.memory_space<vmem>>, vector<8x32xf32>,
    %c56_33 = arith.constant 56 : index
    %c0_34 = arith.constant 0 : index
    %72 = vector.load %arg11[%c56_33, %c0_34] : memref<64x32xf32, #tpu.memory_space<vmem>>, vector<8x32xf32>
    tpu.vector_store %arg11[%c56_33, %c0_34], %70 {strides = array<i32>} : memref<64x32xf32, #tpu.memory_space<vmem>>, vector<8x32xf32>,
    %c8 = arith.constant 8 : index
    %c0_35 = arith.constant 0 : index
    %73 = vector.load %arg1[%c8, %c0_35] : memref<64x1xf32, #tpu.memory_space<vmem>>, vector<8x1xf32>
    %c48 = arith.constant 48 : index
    %c0_36 = arith.constant 0 : index
    %74 = vector.load %arg1[%c48, %c0_36] : memref<64x1xf32, #tpu.memory_space<vmem>>, vector<8x1xf32>
    %c8_37 = arith.constant 8 : index
    %c0_38 = arith.constant 0 : index
    %75 = vector.load %arg8[%c8_37, %c0_38] : memref<64x96xf32, #tpu.memory_space<vmem>>, vector<8x96xf32>
    %c48_39 = arith.constant 48 : index
    %c0_40 = arith.constant 0 : index
    %76 = vector.load %arg9[%c48_39, %c0_40] : memref<64x96xf32, #tpu.memory_space<vmem>>, vector<8x96xf32>
    %cst_41 = arith.constant dense<0.000000e+00> : vector<8x96xf32>
    %77 = tpu.matmul %46, %0, %cst_41 {dimension_numbers = #tpu.dot_dimension_numbers<[1], [0], [0], [1], [0, 0, 1, 1], [], []>} : vector<8x32xf32>, vector<32x96xf32>, vector<8x96xf32> -> vector<8x96xf32>
    %cst_42 = arith.constant dense<0.000000e+00> : vector<8x96xf32>
    %78 = tpu.matmul %70, %1, %cst_42 {dimension_numbers = #tpu.dot_dimension_numbers<[1], [0], [0], [1], [0, 0, 1, 1], [], []>} : vector<8x32xf32>, vector<32x96xf32>, vector<8x96xf32> -> vector<8x96xf32>
    %79 = vector.extract_strided_slice %75 {offsets = [0, 0], sizes = [8, 64], strides = [1, 1]} : vector<8x96xf32> to vector<8x64xf32>
    %80 = vector.extract_strided_slice %77 {offsets = [0, 0], sizes = [8, 64], strides = [1, 1]} : vector<8x96xf32> to vector<8x64xf32>
    %81 = arith.addf %79, %80 : vector<8x64xf32>
    %82 = arith.negf %81 : vector<8x64xf32>
    %83 = math.exp %82 : vector<8x64xf32>
    %cst_43 = arith.constant 1.000000e+00 : f32
    %84 = vector.broadcast %cst_43 : f32 to vector<8x64xf32>
    %85 = arith.addf %84, %83 : vector<8x64xf32>
    %86 = arith.divf %84, %85 : vector<8x64xf32>
    %87 = vector.extract_strided_slice %75 {offsets = [0, 64], sizes = [8, 32], strides = [1, 1]} : vector<8x96xf32> to vector<8x32xf32>
    %88 = vector.extract_strided_slice %86 {offsets = [0, 0], sizes = [8, 32], strides = [1, 1]} : vector<8x64xf32> to vector<8x32xf32>
    %89 = vector.extract_strided_slice %77 {offsets = [0, 64], sizes = [8, 32], strides = [1, 1]} : vector<8x96xf32> to vector<8x32xf32>
    %90 = vector.broadcast %2 : vector<1x32xf32> to vector<8x32xf32>
    %91 = arith.addf %89, %90 : vector<8x32xf32>
    %92 = arith.mulf %88, %91 : vector<8x32xf32>
    %93 = arith.addf %87, %92 : vector<8x32xf32>
    %94 = math.tanh %93 : vector<8x32xf32>
    %95 = vector.extract_strided_slice %86 {offsets = [0, 32], sizes = [8, 32], strides = [1, 1]} : vector<8x64xf32> to vector<8x32xf32>
    %cst_44 = arith.constant 1.000000e+00 : f32
    %96 = vector.broadcast %cst_44 : f32 to vector<8x32xf32>
    %97 = arith.subf %96, %95 : vector<8x32xf32>
    %98 = vector.broadcast %73 : vector<8x1xf32> to vector<8x32xf32>
    %99 = arith.mulf %98, %97 : vector<8x32xf32>
    %100 = arith.subf %94, %46 : vector<8x32xf32>
    %101 = arith.mulf %99, %100 : vector<8x32xf32>
    %102 = arith.addf %46, %101 : vector<8x32xf32>
    %103 = vector.extract_strided_slice %76 {offsets = [0, 0], sizes = [8, 64], strides = [1, 1]} : vector<8x96xf32> to vector<8x64xf32>
    %104 = vector.extract_strided_slice %78 {offsets = [0, 0], sizes = [8, 64], strides = [1, 1]} : vector<8x96xf32> to vector<8x64xf32>
    %105 = arith.addf %103, %104 : vector<8x64xf32>
    %106 = arith.negf %105 : vector<8x64xf32>
    %107 = math.exp %106 : vector<8x64xf32>
    %cst_45 = arith.constant 1.000000e+00 : f32
    %108 = vector.broadcast %cst_45 : f32 to vector<8x64xf32>
    %109 = arith.addf %108, %107 : vector<8x64xf32>
    %110 = arith.divf %108, %109 : vector<8x64xf32>
    %111 = vector.extract_strided_slice %76 {offsets = [0, 64], sizes = [8, 32], strides = [1, 1]} : vector<8x96xf32> to vector<8x32xf32>
    %112 = vector.extract_strided_slice %110 {offsets = [0, 0], sizes = [8, 32], strides = [1, 1]} : vector<8x64xf32> to vector<8x32xf32>
    %113 = vector.extract_strided_slice %78 {offsets = [0, 64], sizes = [8, 32], strides = [1, 1]} : vector<8x96xf32> to vector<8x32xf32>
    %114 = vector.broadcast %3 : vector<1x32xf32> to vector<8x32xf32>
    %115 = arith.addf %113, %114 : vector<8x32xf32>
    %116 = arith.mulf %112, %115 : vector<8x32xf32>
    %117 = arith.addf %111, %116 : vector<8x32xf32>
    %118 = math.tanh %117 : vector<8x32xf32>
    %119 = vector.extract_strided_slice %110 {offsets = [0, 32], sizes = [8, 32], strides = [1, 1]} : vector<8x64xf32> to vector<8x32xf32>
    %cst_46 = arith.constant 1.000000e+00 : f32
    %120 = vector.broadcast %cst_46 : f32 to vector<8x32xf32>
    %121 = arith.subf %120, %119 : vector<8x32xf32>
    %122 = vector.broadcast %74 : vector<8x1xf32> to vector<8x32xf32>
    %123 = arith.mulf %122, %121 : vector<8x32xf32>
    %124 = arith.subf %118, %70 : vector<8x32xf32>
    %125 = arith.mulf %123, %124 : vector<8x32xf32>
    %126 = arith.addf %70, %125 : vector<8x32xf32>
    %c8_47 = arith.constant 8 : index
    %c0_48 = arith.constant 0 : index
    %127 = vector.load %arg10[%c8_47, %c0_48] : memref<64x32xf32, #tpu.memory_space<vmem>>, vector<8x32xf32>
    tpu.vector_store %arg10[%c8_47, %c0_48], %102 {strides = array<i32>} : memref<64x32xf32, #tpu.memory_space<vmem>>, vector<8x32xf32>,
    %c48_49 = arith.constant 48 : index
    %c0_50 = arith.constant 0 : index
    %128 = vector.load %arg11[%c48_49, %c0_50] : memref<64x32xf32, #tpu.memory_space<vmem>>, vector<8x32xf32>
    tpu.vector_store %arg11[%c48_49, %c0_50], %126 {strides = array<i32>} : memref<64x32xf32, #tpu.memory_space<vmem>>, vector<8x32xf32>,
    %c16 = arith.constant 16 : index
    %c0_51 = arith.constant 0 : index
    %129 = vector.load %arg1[%c16, %c0_51] : memref<64x1xf32, #tpu.memory_space<vmem>>, vector<8x1xf32>
    %c40 = arith.constant 40 : index
    %c0_52 = arith.constant 0 : index
    %130 = vector.load %arg1[%c40, %c0_52] : memref<64x1xf32, #tpu.memory_space<vmem>>, vector<8x1xf32>
    %c16_53 = arith.constant 16 : index
    %c0_54 = arith.constant 0 : index
    %131 = vector.load %arg8[%c16_53, %c0_54] : memref<64x96xf32, #tpu.memory_space<vmem>>, vector<8x96xf32>
    %c40_55 = arith.constant 40 : index
    %c0_56 = arith.constant 0 : index
    %132 = vector.load %arg9[%c40_55, %c0_56] : memref<64x96xf32, #tpu.memory_space<vmem>>, vector<8x96xf32>
    %cst_57 = arith.constant dense<0.000000e+00> : vector<8x96xf32>
    %133 = tpu.matmul %102, %0, %cst_57 {dimension_numbers = #tpu.dot_dimension_numbers<[1], [0], [0], [1], [0, 0, 1, 1], [], []>} : vector<8x32xf32>, vector<32x96xf32>, vector<8x96xf32> -> vector<8x96xf32>
    %cst_58 = arith.constant dense<0.000000e+00> : vector<8x96xf32>
    %134 = tpu.matmul %126, %1, %cst_58 {dimension_numbers = #tpu.dot_dimension_numbers<[1], [0], [0], [1], [0, 0, 1, 1], [], []>} : vector<8x32xf32>, vector<32x96xf32>, vector<8x96xf32> -> vector<8x96xf32>
    %135 = vector.extract_strided_slice %131 {offsets = [0, 0], sizes = [8, 64], strides = [1, 1]} : vector<8x96xf32> to vector<8x64xf32>
    %136 = vector.extract_strided_slice %133 {offsets = [0, 0], sizes = [8, 64], strides = [1, 1]} : vector<8x96xf32> to vector<8x64xf32>
    %137 = arith.addf %135, %136 : vector<8x64xf32>
    %138 = arith.negf %137 : vector<8x64xf32>
    %139 = math.exp %138 : vector<8x64xf32>
    %cst_59 = arith.constant 1.000000e+00 : f32
    %140 = vector.broadcast %cst_59 : f32 to vector<8x64xf32>
    %141 = arith.addf %140, %139 : vector<8x64xf32>
    %142 = arith.divf %140, %141 : vector<8x64xf32>
    %143 = vector.extract_strided_slice %131 {offsets = [0, 64], sizes = [8, 32], strides = [1, 1]} : vector<8x96xf32> to vector<8x32xf32>
    %144 = vector.extract_strided_slice %142 {offsets = [0, 0], sizes = [8, 32], strides = [1, 1]} : vector<8x64xf32> to vector<8x32xf32>
    %145 = vector.extract_strided_slice %133 {offsets = [0, 64], sizes = [8, 32], strides = [1, 1]} : vector<8x96xf32> to vector<8x32xf32>
    %146 = vector.broadcast %2 : vector<1x32xf32> to vector<8x32xf32>
    %147 = arith.addf %145, %146 : vector<8x32xf32>
    %148 = arith.mulf %144, %147 : vector<8x32xf32>
    %149 = arith.addf %143, %148 : vector<8x32xf32>
    %150 = math.tanh %149 : vector<8x32xf32>
    %151 = vector.extract_strided_slice %142 {offsets = [0, 32], sizes = [8, 32], strides = [1, 1]} : vector<8x64xf32> to vector<8x32xf32>
    %cst_60 = arith.constant 1.000000e+00 : f32
    %152 = vector.broadcast %cst_60 : f32 to vector<8x32xf32>
    %153 = arith.subf %152, %151 : vector<8x32xf32>
    %154 = vector.broadcast %129 : vector<8x1xf32> to vector<8x32xf32>
    %155 = arith.mulf %154, %153 : vector<8x32xf32>
    %156 = arith.subf %150, %102 : vector<8x32xf32>
    %157 = arith.mulf %155, %156 : vector<8x32xf32>
    %158 = arith.addf %102, %157 : vector<8x32xf32>
    %159 = vector.extract_strided_slice %132 {offsets = [0, 0], sizes = [8, 64], strides = [1, 1]} : vector<8x96xf32> to vector<8x64xf32>
    %160 = vector.extract_strided_slice %134 {offsets = [0, 0], sizes = [8, 64], strides = [1, 1]} : vector<8x96xf32> to vector<8x64xf32>
    %161 = arith.addf %159, %160 : vector<8x64xf32>
    %162 = arith.negf %161 : vector<8x64xf32>
    %163 = math.exp %162 : vector<8x64xf32>
    %cst_61 = arith.constant 1.000000e+00 : f32
    %164 = vector.broadcast %cst_61 : f32 to vector<8x64xf32>
    %165 = arith.addf %164, %163 : vector<8x64xf32>
    %166 = arith.divf %164, %165 : vector<8x64xf32>
    %167 = vector.extract_strided_slice %132 {offsets = [0, 64], sizes = [8, 32], strides = [1, 1]} : vector<8x96xf32> to vector<8x32xf32>
    %168 = vector.extract_strided_slice %166 {offsets = [0, 0], sizes = [8, 32], strides = [1, 1]} : vector<8x64xf32> to vector<8x32xf32>
    %169 = vector.extract_strided_slice %134 {offsets = [0, 64], sizes = [8, 32], strides = [1, 1]} : vector<8x96xf32> to vector<8x32xf32>
    %170 = vector.broadcast %3 : vector<1x32xf32> to vector<8x32xf32>
    %171 = arith.addf %169, %170 : vector<8x32xf32>
    %172 = arith.mulf %168, %171 : vector<8x32xf32>
    %173 = arith.addf %167, %172 : vector<8x32xf32>
    %174 = math.tanh %173 : vector<8x32xf32>
    %175 = vector.extract_strided_slice %166 {offsets = [0, 32], sizes = [8, 32], strides = [1, 1]} : vector<8x64xf32> to vector<8x32xf32>
    %cst_62 = arith.constant 1.000000e+00 : f32
    %176 = vector.broadcast %cst_62 : f32 to vector<8x32xf32>
    %177 = arith.subf %176, %175 : vector<8x32xf32>
    %178 = vector.broadcast %130 : vector<8x1xf32> to vector<8x32xf32>
    %179 = arith.mulf %178, %177 : vector<8x32xf32>
    %180 = arith.subf %174, %126 : vector<8x32xf32>
    %181 = arith.mulf %179, %180 : vector<8x32xf32>
    %182 = arith.addf %126, %181 : vector<8x32xf32>
    %c16_63 = arith.constant 16 : index
    %c0_64 = arith.constant 0 : index
    %183 = vector.load %arg10[%c16_63, %c0_64] : memref<64x32xf32, #tpu.memory_space<vmem>>, vector<8x32xf32>
    tpu.vector_store %arg10[%c16_63, %c0_64], %158 {strides = array<i32>} : memref<64x32xf32, #tpu.memory_space<vmem>>, vector<8x32xf32>,
    %c40_65 = arith.constant 40 : index
    %c0_66 = arith.constant 0 : index
    %184 = vector.load %arg11[%c40_65, %c0_66] : memref<64x32xf32, #tpu.memory_space<vmem>>, vector<8x32xf32>
    tpu.vector_store %arg11[%c40_65, %c0_66], %182 {strides = array<i32>} : memref<64x32xf32, #tpu.memory_space<vmem>>, vector<8x32xf32>,
    %c24 = arith.constant 24 : index
    %c0_67 = arith.constant 0 : index
    %185 = vector.load %arg1[%c24, %c0_67] : memref<64x1xf32, #tpu.memory_space<vmem>>, vector<8x1xf32>
    %c32 = arith.constant 32 : index
    %c0_68 = arith.constant 0 : index
    %186 = vector.load %arg1[%c32, %c0_68] : memref<64x1xf32, #tpu.memory_space<vmem>>, vector<8x1xf32>
    %c24_69 = arith.constant 24 : index
    %c0_70 = arith.constant 0 : index
    %187 = vector.load %arg8[%c24_69, %c0_70] : memref<64x96xf32, #tpu.memory_space<vmem>>, vector<8x96xf32>
    %c32_71 = arith.constant 32 : index
    %c0_72 = arith.constant 0 : index
    %188 = vector.load %arg9[%c32_71, %c0_72] : memref<64x96xf32, #tpu.memory_space<vmem>>, vector<8x96xf32>
    %cst_73 = arith.constant dense<0.000000e+00> : vector<8x96xf32>
    %189 = tpu.matmul %158, %0, %cst_73 {dimension_numbers = #tpu.dot_dimension_numbers<[1], [0], [0], [1], [0, 0, 1, 1], [], []>} : vector<8x32xf32>, vector<32x96xf32>, vector<8x96xf32> -> vector<8x96xf32>
    %cst_74 = arith.constant dense<0.000000e+00> : vector<8x96xf32>
    %190 = tpu.matmul %182, %1, %cst_74 {dimension_numbers = #tpu.dot_dimension_numbers<[1], [0], [0], [1], [0, 0, 1, 1], [], []>} : vector<8x32xf32>, vector<32x96xf32>, vector<8x96xf32> -> vector<8x96xf32>
    %191 = vector.extract_strided_slice %187 {offsets = [0, 0], sizes = [8, 64], strides = [1, 1]} : vector<8x96xf32> to vector<8x64xf32>
    %192 = vector.extract_strided_slice %189 {offsets = [0, 0], sizes = [8, 64], strides = [1, 1]} : vector<8x96xf32> to vector<8x64xf32>
    %193 = arith.addf %191, %192 : vector<8x64xf32>
    %194 = arith.negf %193 : vector<8x64xf32>
    %195 = math.exp %194 : vector<8x64xf32>
    %cst_75 = arith.constant 1.000000e+00 : f32
    %196 = vector.broadcast %cst_75 : f32 to vector<8x64xf32>
    %197 = arith.addf %196, %195 : vector<8x64xf32>
    %198 = arith.divf %196, %197 : vector<8x64xf32>
    %199 = vector.extract_strided_slice %187 {offsets = [0, 64], sizes = [8, 32], strides = [1, 1]} : vector<8x96xf32> to vector<8x32xf32>
    %200 = vector.extract_strided_slice %198 {offsets = [0, 0], sizes = [8, 32], strides = [1, 1]} : vector<8x64xf32> to vector<8x32xf32>
    %201 = vector.extract_strided_slice %189 {offsets = [0, 64], sizes = [8, 32], strides = [1, 1]} : vector<8x96xf32> to vector<8x32xf32>
    %202 = vector.broadcast %2 : vector<1x32xf32> to vector<8x32xf32>
    %203 = arith.addf %201, %202 : vector<8x32xf32>
    %204 = arith.mulf %200, %203 : vector<8x32xf32>
    %205 = arith.addf %199, %204 : vector<8x32xf32>
    %206 = math.tanh %205 : vector<8x32xf32>
    %207 = vector.extract_strided_slice %198 {offsets = [0, 32], sizes = [8, 32], strides = [1, 1]} : vector<8x64xf32> to vector<8x32xf32>
    %cst_76 = arith.constant 1.000000e+00 : f32
    %208 = vector.broadcast %cst_76 : f32 to vector<8x32xf32>
    %209 = arith.subf %208, %207 : vector<8x32xf32>
    %210 = vector.broadcast %185 : vector<8x1xf32> to vector<8x32xf32>
    %211 = arith.mulf %210, %209 : vector<8x32xf32>
    %212 = arith.subf %206, %158 : vector<8x32xf32>
    %213 = arith.mulf %211, %212 : vector<8x32xf32>
    %214 = arith.addf %158, %213 : vector<8x32xf32>
    %215 = vector.extract_strided_slice %188 {offsets = [0, 0], sizes = [8, 64], strides = [1, 1]} : vector<8x96xf32> to vector<8x64xf32>
    %216 = vector.extract_strided_slice %190 {offsets = [0, 0], sizes = [8, 64], strides = [1, 1]} : vector<8x96xf32> to vector<8x64xf32>
    %217 = arith.addf %215, %216 : vector<8x64xf32>
    %218 = arith.negf %217 : vector<8x64xf32>
    %219 = math.exp %218 : vector<8x64xf32>
    %cst_77 = arith.constant 1.000000e+00 : f32
    %220 = vector.broadcast %cst_77 : f32 to vector<8x64xf32>
    %221 = arith.addf %220, %219 : vector<8x64xf32>
    %222 = arith.divf %220, %221 : vector<8x64xf32>
    %223 = vector.extract_strided_slice %188 {offsets = [0, 64], sizes = [8, 32], strides = [1, 1]} : vector<8x96xf32> to vector<8x32xf32>
    %224 = vector.extract_strided_slice %222 {offsets = [0, 0], sizes = [8, 32], strides = [1, 1]} : vector<8x64xf32> to vector<8x32xf32>
    %225 = vector.extract_strided_slice %190 {offsets = [0, 64], sizes = [8, 32], strides = [1, 1]} : vector<8x96xf32> to vector<8x32xf32>
    %226 = vector.broadcast %3 : vector<1x32xf32> to vector<8x32xf32>
    %227 = arith.addf %225, %226 : vector<8x32xf32>
    %228 = arith.mulf %224, %227 : vector<8x32xf32>
    %229 = arith.addf %223, %228 : vector<8x32xf32>
    %230 = math.tanh %229 : vector<8x32xf32>
    %231 = vector.extract_strided_slice %222 {offsets = [0, 32], sizes = [8, 32], strides = [1, 1]} : vector<8x64xf32> to vector<8x32xf32>
    %cst_78 = arith.constant 1.000000e+00 : f32
    %232 = vector.broadcast %cst_78 : f32 to vector<8x32xf32>
    %233 = arith.subf %232, %231 : vector<8x32xf32>
    %234 = vector.broadcast %186 : vector<8x1xf32> to vector<8x32xf32>
    %235 = arith.mulf %234, %233 : vector<8x32xf32>
    %236 = arith.subf %230, %182 : vector<8x32xf32>
    %237 = arith.mulf %235, %236 : vector<8x32xf32>
    %238 = arith.addf %182, %237 : vector<8x32xf32>
    %c24_79 = arith.constant 24 : index
    %c0_80 = arith.constant 0 : index
    %239 = vector.load %arg10[%c24_79, %c0_80] : memref<64x32xf32, #tpu.memory_space<vmem>>, vector<8x32xf32>
    tpu.vector_store %arg10[%c24_79, %c0_80], %214 {strides = array<i32>} : memref<64x32xf32, #tpu.memory_space<vmem>>, vector<8x32xf32>,
    %c32_81 = arith.constant 32 : index
    %c0_82 = arith.constant 0 : index
    %240 = vector.load %arg11[%c32_81, %c0_82] : memref<64x32xf32, #tpu.memory_space<vmem>>, vector<8x32xf32>
    tpu.vector_store %arg11[%c32_81, %c0_82], %238 {strides = array<i32>} : memref<64x32xf32, #tpu.memory_space<vmem>>, vector<8x32xf32>,
    %c32_83 = arith.constant 32 : index
    %c0_84 = arith.constant 0 : index
    %241 = vector.load %arg1[%c32_83, %c0_84] : memref<64x1xf32, #tpu.memory_space<vmem>>, vector<8x1xf32>
    %c24_85 = arith.constant 24 : index
    %c0_86 = arith.constant 0 : index
    %242 = vector.load %arg1[%c24_85, %c0_86] : memref<64x1xf32, #tpu.memory_space<vmem>>, vector<8x1xf32>
    %c32_87 = arith.constant 32 : index
    %c0_88 = arith.constant 0 : index
    %243 = vector.load %arg8[%c32_87, %c0_88] : memref<64x96xf32, #tpu.memory_space<vmem>>, vector<8x96xf32>
    %c24_89 = arith.constant 24 : index
    %c0_90 = arith.constant 0 : index
    %244 = vector.load %arg9[%c24_89, %c0_90] : memref<64x96xf32, #tpu.memory_space<vmem>>, vector<8x96xf32>
    %cst_91 = arith.constant dense<0.000000e+00> : vector<8x96xf32>
    %245 = tpu.matmul %214, %0, %cst_91 {dimension_numbers = #tpu.dot_dimension_numbers<[1], [0], [0], [1], [0, 0, 1, 1], [], []>} : vector<8x32xf32>, vector<32x96xf32>, vector<8x96xf32> -> vector<8x96xf32>
    %cst_92 = arith.constant dense<0.000000e+00> : vector<8x96xf32>
    %246 = tpu.matmul %238, %1, %cst_92 {dimension_numbers = #tpu.dot_dimension_numbers<[1], [0], [0], [1], [0, 0, 1, 1], [], []>} : vector<8x32xf32>, vector<32x96xf32>, vector<8x96xf32> -> vector<8x96xf32>
    %247 = vector.extract_strided_slice %243 {offsets = [0, 0], sizes = [8, 64], strides = [1, 1]} : vector<8x96xf32> to vector<8x64xf32>
    %248 = vector.extract_strided_slice %245 {offsets = [0, 0], sizes = [8, 64], strides = [1, 1]} : vector<8x96xf32> to vector<8x64xf32>
    %249 = arith.addf %247, %248 : vector<8x64xf32>
    %250 = arith.negf %249 : vector<8x64xf32>
    %251 = math.exp %250 : vector<8x64xf32>
    %cst_93 = arith.constant 1.000000e+00 : f32
    %252 = vector.broadcast %cst_93 : f32 to vector<8x64xf32>
    %253 = arith.addf %252, %251 : vector<8x64xf32>
    %254 = arith.divf %252, %253 : vector<8x64xf32>
    %255 = vector.extract_strided_slice %243 {offsets = [0, 64], sizes = [8, 32], strides = [1, 1]} : vector<8x96xf32> to vector<8x32xf32>
    %256 = vector.extract_strided_slice %254 {offsets = [0, 0], sizes = [8, 32], strides = [1, 1]} : vector<8x64xf32> to vector<8x32xf32>
    %257 = vector.extract_strided_slice %245 {offsets = [0, 64], sizes = [8, 32], strides = [1, 1]} : vector<8x96xf32> to vector<8x32xf32>
    %258 = vector.broadcast %2 : vector<1x32xf32> to vector<8x32xf32>
    %259 = arith.addf %257, %258 : vector<8x32xf32>
    %260 = arith.mulf %256, %259 : vector<8x32xf32>
    %261 = arith.addf %255, %260 : vector<8x32xf32>
    %262 = math.tanh %261 : vector<8x32xf32>
    %263 = vector.extract_strided_slice %254 {offsets = [0, 32], sizes = [8, 32], strides = [1, 1]} : vector<8x64xf32> to vector<8x32xf32>
    %cst_94 = arith.constant 1.000000e+00 : f32
    %264 = vector.broadcast %cst_94 : f32 to vector<8x32xf32>
    %265 = arith.subf %264, %263 : vector<8x32xf32>
    %266 = vector.broadcast %241 : vector<8x1xf32> to vector<8x32xf32>
    %267 = arith.mulf %266, %265 : vector<8x32xf32>
    %268 = arith.subf %262, %214 : vector<8x32xf32>
    %269 = arith.mulf %267, %268 : vector<8x32xf32>
    %270 = arith.addf %214, %269 : vector<8x32xf32>
    %271 = vector.extract_strided_slice %244 {offsets = [0, 0], sizes = [8, 64], strides = [1, 1]} : vector<8x96xf32> to vector<8x64xf32>
    %272 = vector.extract_strided_slice %246 {offsets = [0, 0], sizes = [8, 64], strides = [1, 1]} : vector<8x96xf32> to vector<8x64xf32>
    %273 = arith.addf %271, %272 : vector<8x64xf32>
    %274 = arith.negf %273 : vector<8x64xf32>
    %275 = math.exp %274 : vector<8x64xf32>
    %cst_95 = arith.constant 1.000000e+00 : f32
    %276 = vector.broadcast %cst_95 : f32 to vector<8x64xf32>
    %277 = arith.addf %276, %275 : vector<8x64xf32>
    %278 = arith.divf %276, %277 : vector<8x64xf32>
    %279 = vector.extract_strided_slice %244 {offsets = [0, 64], sizes = [8, 32], strides = [1, 1]} : vector<8x96xf32> to vector<8x32xf32>
    %280 = vector.extract_strided_slice %278 {offsets = [0, 0], sizes = [8, 32], strides = [1, 1]} : vector<8x64xf32> to vector<8x32xf32>
    %281 = vector.extract_strided_slice %246 {offsets = [0, 64], sizes = [8, 32], strides = [1, 1]} : vector<8x96xf32> to vector<8x32xf32>
    %282 = vector.broadcast %3 : vector<1x32xf32> to vector<8x32xf32>
    %283 = arith.addf %281, %282 : vector<8x32xf32>
    %284 = arith.mulf %280, %283 : vector<8x32xf32>
    %285 = arith.addf %279, %284 : vector<8x32xf32>
    %286 = math.tanh %285 : vector<8x32xf32>
    %287 = vector.extract_strided_slice %278 {offsets = [0, 32], sizes = [8, 32], strides = [1, 1]} : vector<8x64xf32> to vector<8x32xf32>
    %cst_96 = arith.constant 1.000000e+00 : f32
    %288 = vector.broadcast %cst_96 : f32 to vector<8x32xf32>
    %289 = arith.subf %288, %287 : vector<8x32xf32>
    %290 = vector.broadcast %242 : vector<8x1xf32> to vector<8x32xf32>
    %291 = arith.mulf %290, %289 : vector<8x32xf32>
    %292 = arith.subf %286, %238 : vector<8x32xf32>
    %293 = arith.mulf %291, %292 : vector<8x32xf32>
    %294 = arith.addf %238, %293 : vector<8x32xf32>
    %c32_97 = arith.constant 32 : index
    %c0_98 = arith.constant 0 : index
    %295 = vector.load %arg11[%c32_97, %c0_98] : memref<64x32xf32, #tpu.memory_space<vmem>>, vector<8x32xf32>
    %296 = arith.addf %270, %295 : vector<8x32xf32>
    %cst_99 = arith.constant 5.000000e-01 : f32
    %297 = vector.broadcast %cst_99 : f32 to vector<8x32xf32>
    %298 = arith.mulf %297, %296 : vector<8x32xf32>
    %cst_100 = arith.constant 0.000000e+00 : f32
    %299 = vector.broadcast %cst_100 : f32 to vector<8x1xf32>
    %300 = arith.cmpf ogt, %241, %299 : vector<8x1xf32>
    %cst_101 = arith.constant 0xFF800000 : f32
    %301 = vector.shape_cast %300 : vector<8x1xi1> to vector<8x1xi1>
    %302 = vector.broadcast %301 : vector<8x1xi1> to vector<8x32xi1>
    %303 = vector.broadcast %cst_101 : f32 to vector<8x32xf32>
    %304 = arith.select %302, %298, %303 : vector<8x32xi1>, vector<8x32xf32>
    %305 = arith.maximumf %16, %304 : vector<8x32xf32>
    %c24_102 = arith.constant 24 : index
    %c0_103 = arith.constant 0 : index
    %306 = vector.load %arg10[%c24_102, %c0_103] : memref<64x32xf32, #tpu.memory_space<vmem>>, vector<8x32xf32>
    %307 = arith.addf %306, %294 : vector<8x32xf32>
    %cst_104 = arith.constant 5.000000e-01 : f32
    %308 = vector.broadcast %cst_104 : f32 to vector<8x32xf32>
    %309 = arith.mulf %308, %307 : vector<8x32xf32>
    %cst_105 = arith.constant 0.000000e+00 : f32
    %310 = vector.broadcast %cst_105 : f32 to vector<8x1xf32>
    %311 = arith.cmpf ogt, %242, %310 : vector<8x1xf32>
    %cst_106 = arith.constant 0xFF800000 : f32
    %312 = vector.shape_cast %311 : vector<8x1xi1> to vector<8x1xi1>
    %313 = vector.broadcast %312 : vector<8x1xi1> to vector<8x32xi1>
    %314 = vector.broadcast %cst_106 : f32 to vector<8x32xf32>
    %315 = arith.select %313, %309, %314 : vector<8x32xi1>, vector<8x32xf32>
    %316 = arith.maximumf %305, %315 : vector<8x32xf32>
    %c40_107 = arith.constant 40 : index
    %c0_108 = arith.constant 0 : index
    %317 = vector.load %arg1[%c40_107, %c0_108] : memref<64x1xf32, #tpu.memory_space<vmem>>, vector<8x1xf32>
    %c16_109 = arith.constant 16 : index
    %c0_110 = arith.constant 0 : index
    %318 = vector.load %arg1[%c16_109, %c0_110] : memref<64x1xf32, #tpu.memory_space<vmem>>, vector<8x1xf32>
    %c40_111 = arith.constant 40 : index
    %c0_112 = arith.constant 0 : index
    %319 = vector.load %arg8[%c40_111, %c0_112] : memref<64x96xf32, #tpu.memory_space<vmem>>, vector<8x96xf32>
    %c16_113 = arith.constant 16 : index
    %c0_114 = arith.constant 0 : index
    %320 = vector.load %arg9[%c16_113, %c0_114] : memref<64x96xf32, #tpu.memory_space<vmem>>, vector<8x96xf32>
    %cst_115 = arith.constant dense<0.000000e+00> : vector<8x96xf32>
    %321 = tpu.matmul %270, %0, %cst_115 {dimension_numbers = #tpu.dot_dimension_numbers<[1], [0], [0], [1], [0, 0, 1, 1], [], []>} : vector<8x32xf32>, vector<32x96xf32>, vector<8x96xf32> -> vector<8x96xf32>
    %cst_116 = arith.constant dense<0.000000e+00> : vector<8x96xf32>
    %322 = tpu.matmul %294, %1, %cst_116 {dimension_numbers = #tpu.dot_dimension_numbers<[1], [0], [0], [1], [0, 0, 1, 1], [], []>} : vector<8x32xf32>, vector<32x96xf32>, vector<8x96xf32> -> vector<8x96xf32>
    %323 = vector.extract_strided_slice %319 {offsets = [0, 0], sizes = [8, 64], strides = [1, 1]} : vector<8x96xf32> to vector<8x64xf32>
    %324 = vector.extract_strided_slice %321 {offsets = [0, 0], sizes = [8, 64], strides = [1, 1]} : vector<8x96xf32> to vector<8x64xf32>
    %325 = arith.addf %323, %324 : vector<8x64xf32>
    %326 = arith.negf %325 : vector<8x64xf32>
    %327 = math.exp %326 : vector<8x64xf32>
    %cst_117 = arith.constant 1.000000e+00 : f32
    %328 = vector.broadcast %cst_117 : f32 to vector<8x64xf32>
    %329 = arith.addf %328, %327 : vector<8x64xf32>
    %330 = arith.divf %328, %329 : vector<8x64xf32>
    %331 = vector.extract_strided_slice %319 {offsets = [0, 64], sizes = [8, 32], strides = [1, 1]} : vector<8x96xf32> to vector<8x32xf32>
    %332 = vector.extract_strided_slice %330 {offsets = [0, 0], sizes = [8, 32], strides = [1, 1]} : vector<8x64xf32> to vector<8x32xf32>
    %333 = vector.extract_strided_slice %321 {offsets = [0, 64], sizes = [8, 32], strides = [1, 1]} : vector<8x96xf32> to vector<8x32xf32>
    %334 = vector.broadcast %2 : vector<1x32xf32> to vector<8x32xf32>
    %335 = arith.addf %333, %334 : vector<8x32xf32>
    %336 = arith.mulf %332, %335 : vector<8x32xf32>
    %337 = arith.addf %331, %336 : vector<8x32xf32>
    %338 = math.tanh %337 : vector<8x32xf32>
    %339 = vector.extract_strided_slice %330 {offsets = [0, 32], sizes = [8, 32], strides = [1, 1]} : vector<8x64xf32> to vector<8x32xf32>
    %cst_118 = arith.constant 1.000000e+00 : f32
    %340 = vector.broadcast %cst_118 : f32 to vector<8x32xf32>
    %341 = arith.subf %340, %339 : vector<8x32xf32>
    %342 = vector.broadcast %317 : vector<8x1xf32> to vector<8x32xf32>
    %343 = arith.mulf %342, %341 : vector<8x32xf32>
    %344 = arith.subf %338, %270 : vector<8x32xf32>
    %345 = arith.mulf %343, %344 : vector<8x32xf32>
    %346 = arith.addf %270, %345 : vector<8x32xf32>
    %347 = vector.extract_strided_slice %320 {offsets = [0, 0], sizes = [8, 64], strides = [1, 1]} : vector<8x96xf32> to vector<8x64xf32>
    %348 = vector.extract_strided_slice %322 {offsets = [0, 0], sizes = [8, 64], strides = [1, 1]} : vector<8x96xf32> to vector<8x64xf32>
    %349 = arith.addf %347, %348 : vector<8x64xf32>
    %350 = arith.negf %349 : vector<8x64xf32>
    %351 = math.exp %350 : vector<8x64xf32>
    %cst_119 = arith.constant 1.000000e+00 : f32
    %352 = vector.broadcast %cst_119 : f32 to vector<8x64xf32>
    %353 = arith.addf %352, %351 : vector<8x64xf32>
    %354 = arith.divf %352, %353 : vector<8x64xf32>
    %355 = vector.extract_strided_slice %320 {offsets = [0, 64], sizes = [8, 32], strides = [1, 1]} : vector<8x96xf32> to vector<8x32xf32>
    %356 = vector.extract_strided_slice %354 {offsets = [0, 0], sizes = [8, 32], strides = [1, 1]} : vector<8x64xf32> to vector<8x32xf32>
    %357 = vector.extract_strided_slice %322 {offsets = [0, 64], sizes = [8, 32], strides = [1, 1]} : vector<8x96xf32> to vector<8x32xf32>
    %358 = vector.broadcast %3 : vector<1x32xf32> to vector<8x32xf32>
    %359 = arith.addf %357, %358 : vector<8x32xf32>
    %360 = arith.mulf %356, %359 : vector<8x32xf32>
    %361 = arith.addf %355, %360 : vector<8x32xf32>
    %362 = math.tanh %361 : vector<8x32xf32>
    %363 = vector.extract_strided_slice %354 {offsets = [0, 32], sizes = [8, 32], strides = [1, 1]} : vector<8x64xf32> to vector<8x32xf32>
    %cst_120 = arith.constant 1.000000e+00 : f32
    %364 = vector.broadcast %cst_120 : f32 to vector<8x32xf32>
    %365 = arith.subf %364, %363 : vector<8x32xf32>
    %366 = vector.broadcast %318 : vector<8x1xf32> to vector<8x32xf32>
    %367 = arith.mulf %366, %365 : vector<8x32xf32>
    %368 = arith.subf %362, %294 : vector<8x32xf32>
    %369 = arith.mulf %367, %368 : vector<8x32xf32>
    %370 = arith.addf %294, %369 : vector<8x32xf32>
    %c40_121 = arith.constant 40 : index
    %c0_122 = arith.constant 0 : index
    %371 = vector.load %arg11[%c40_121, %c0_122] : memref<64x32xf32, #tpu.memory_space<vmem>>, vector<8x32xf32>
    %372 = arith.addf %346, %371 : vector<8x32xf32>
    %cst_123 = arith.constant 5.000000e-01 : f32
    %373 = vector.broadcast %cst_123 : f32 to vector<8x32xf32>
    %374 = arith.mulf %373, %372 : vector<8x32xf32>
    %cst_124 = arith.constant 0.000000e+00 : f32
    %375 = vector.broadcast %cst_124 : f32 to vector<8x1xf32>
    %376 = arith.cmpf ogt, %317, %375 : vector<8x1xf32>
    %cst_125 = arith.constant 0xFF800000 : f32
    %377 = vector.shape_cast %376 : vector<8x1xi1> to vector<8x1xi1>
    %378 = vector.broadcast %377 : vector<8x1xi1> to vector<8x32xi1>
    %379 = vector.broadcast %cst_125 : f32 to vector<8x32xf32>
    %380 = arith.select %378, %374, %379 : vector<8x32xi1>, vector<8x32xf32>
    %381 = arith.maximumf %316, %380 : vector<8x32xf32>
    %c16_126 = arith.constant 16 : index
    %c0_127 = arith.constant 0 : index
    %382 = vector.load %arg10[%c16_126, %c0_127] : memref<64x32xf32, #tpu.memory_space<vmem>>, vector<8x32xf32>
    %383 = arith.addf %382, %370 : vector<8x32xf32>
    %cst_128 = arith.constant 5.000000e-01 : f32
    %384 = vector.broadcast %cst_128 : f32 to vector<8x32xf32>
    %385 = arith.mulf %384, %383 : vector<8x32xf32>
    %cst_129 = arith.constant 0.000000e+00 : f32
    %386 = vector.broadcast %cst_129 : f32 to vector<8x1xf32>
    %387 = arith.cmpf ogt, %318, %386 : vector<8x1xf32>
    %cst_130 = arith.constant 0xFF800000 : f32
    %388 = vector.shape_cast %387 : vector<8x1xi1> to vector<8x1xi1>
    %389 = vector.broadcast %388 : vector<8x1xi1> to vector<8x32xi1>
    %390 = vector.broadcast %cst_130 : f32 to vector<8x32xf32>
    %391 = arith.select %389, %385, %390 : vector<8x32xi1>, vector<8x32xf32>
    %392 = arith.maximumf %381, %391 : vector<8x32xf32>
    %c48_131 = arith.constant 48 : index
    %c0_132 = arith.constant 0 : index
    %393 = vector.load %arg1[%c48_131, %c0_132] : memref<64x1xf32, #tpu.memory_space<vmem>>, vector<8x1xf32>
    %c8_133 = arith.constant 8 : index
    %c0_134 = arith.constant 0 : index
    %394 = vector.load %arg1[%c8_133, %c0_134] : memref<64x1xf32, #tpu.memory_space<vmem>>, vector<8x1xf32>
    %c48_135 = arith.constant 48 : index
    %c0_136 = arith.constant 0 : index
    %395 = vector.load %arg8[%c48_135, %c0_136] : memref<64x96xf32, #tpu.memory_space<vmem>>, vector<8x96xf32>
    %c8_137 = arith.constant 8 : index
    %c0_138 = arith.constant 0 : index
    %396 = vector.load %arg9[%c8_137, %c0_138] : memref<64x96xf32, #tpu.memory_space<vmem>>, vector<8x96xf32>
    %cst_139 = arith.constant dense<0.000000e+00> : vector<8x96xf32>
    %397 = tpu.matmul %346, %0, %cst_139 {dimension_numbers = #tpu.dot_dimension_numbers<[1], [0], [0], [1], [0, 0, 1, 1], [], []>} : vector<8x32xf32>, vector<32x96xf32>, vector<8x96xf32> -> vector<8x96xf32>
    %cst_140 = arith.constant dense<0.000000e+00> : vector<8x96xf32>
    %398 = tpu.matmul %370, %1, %cst_140 {dimension_numbers = #tpu.dot_dimension_numbers<[1], [0], [0], [1], [0, 0, 1, 1], [], []>} : vector<8x32xf32>, vector<32x96xf32>, vector<8x96xf32> -> vector<8x96xf32>
    %399 = vector.extract_strided_slice %395 {offsets = [0, 0], sizes = [8, 64], strides = [1, 1]} : vector<8x96xf32> to vector<8x64xf32>
    %400 = vector.extract_strided_slice %397 {offsets = [0, 0], sizes = [8, 64], strides = [1, 1]} : vector<8x96xf32> to vector<8x64xf32>
    %401 = arith.addf %399, %400 : vector<8x64xf32>
    %402 = arith.negf %401 : vector<8x64xf32>
    %403 = math.exp %402 : vector<8x64xf32>
    %cst_141 = arith.constant 1.000000e+00 : f32
    %404 = vector.broadcast %cst_141 : f32 to vector<8x64xf32>
    %405 = arith.addf %404, %403 : vector<8x64xf32>
    %406 = arith.divf %404, %405 : vector<8x64xf32>
    %407 = vector.extract_strided_slice %395 {offsets = [0, 64], sizes = [8, 32], strides = [1, 1]} : vector<8x96xf32> to vector<8x32xf32>
    %408 = vector.extract_strided_slice %406 {offsets = [0, 0], sizes = [8, 32], strides = [1, 1]} : vector<8x64xf32> to vector<8x32xf32>
    %409 = vector.extract_strided_slice %397 {offsets = [0, 64], sizes = [8, 32], strides = [1, 1]} : vector<8x96xf32> to vector<8x32xf32>
    %410 = vector.broadcast %2 : vector<1x32xf32> to vector<8x32xf32>
    %411 = arith.addf %409, %410 : vector<8x32xf32>
    %412 = arith.mulf %408, %411 : vector<8x32xf32>
    %413 = arith.addf %407, %412 : vector<8x32xf32>
    %414 = math.tanh %413 : vector<8x32xf32>
    %415 = vector.extract_strided_slice %406 {offsets = [0, 32], sizes = [8, 32], strides = [1, 1]} : vector<8x64xf32> to vector<8x32xf32>
    %cst_142 = arith.constant 1.000000e+00 : f32
    %416 = vector.broadcast %cst_142 : f32 to vector<8x32xf32>
    %417 = arith.subf %416, %415 : vector<8x32xf32>
    %418 = vector.broadcast %393 : vector<8x1xf32> to vector<8x32xf32>
    %419 = arith.mulf %418, %417 : vector<8x32xf32>
    %420 = arith.subf %414, %346 : vector<8x32xf32>
    %421 = arith.mulf %419, %420 : vector<8x32xf32>
    %422 = arith.addf %346, %421 : vector<8x32xf32>
    %423 = vector.extract_strided_slice %396 {offsets = [0, 0], sizes = [8, 64], strides = [1, 1]} : vector<8x96xf32> to vector<8x64xf32>
    %424 = vector.extract_strided_slice %398 {offsets = [0, 0], sizes = [8, 64], strides = [1, 1]} : vector<8x96xf32> to vector<8x64xf32>
    %425 = arith.addf %423, %424 : vector<8x64xf32>
    %426 = arith.negf %425 : vector<8x64xf32>
    %427 = math.exp %426 : vector<8x64xf32>
    %cst_143 = arith.constant 1.000000e+00 : f32
    %428 = vector.broadcast %cst_143 : f32 to vector<8x64xf32>
    %429 = arith.addf %428, %427 : vector<8x64xf32>
    %430 = arith.divf %428, %429 : vector<8x64xf32>
    %431 = vector.extract_strided_slice %396 {offsets = [0, 64], sizes = [8, 32], strides = [1, 1]} : vector<8x96xf32> to vector<8x32xf32>
    %432 = vector.extract_strided_slice %430 {offsets = [0, 0], sizes = [8, 32], strides = [1, 1]} : vector<8x64xf32> to vector<8x32xf32>
    %433 = vector.extract_strided_slice %398 {offsets = [0, 64], sizes = [8, 32], strides = [1, 1]} : vector<8x96xf32> to vector<8x32xf32>
    %434 = vector.broadcast %3 : vector<1x32xf32> to vector<8x32xf32>
    %435 = arith.addf %433, %434 : vector<8x32xf32>
    %436 = arith.mulf %432, %435 : vector<8x32xf32>
    %437 = arith.addf %431, %436 : vector<8x32xf32>
    %438 = math.tanh %437 : vector<8x32xf32>
    %439 = vector.extract_strided_slice %430 {offsets = [0, 32], sizes = [8, 32], strides = [1, 1]} : vector<8x64xf32> to vector<8x32xf32>
    %cst_144 = arith.constant 1.000000e+00 : f32
    %440 = vector.broadcast %cst_144 : f32 to vector<8x32xf32>
    %441 = arith.subf %440, %439 : vector<8x32xf32>
    %442 = vector.broadcast %394 : vector<8x1xf32> to vector<8x32xf32>
    %443 = arith.mulf %442, %441 : vector<8x32xf32>
    %444 = arith.subf %438, %370 : vector<8x32xf32>
    %445 = arith.mulf %443, %444 : vector<8x32xf32>
    %446 = arith.addf %370, %445 : vector<8x32xf32>
    %c48_145 = arith.constant 48 : index
    %c0_146 = arith.constant 0 : index
    %447 = vector.load %arg11[%c48_145, %c0_146] : memref<64x32xf32, #tpu.memory_space<vmem>>, vector<8x32xf32>
    %448 = arith.addf %422, %447 : vector<8x32xf32>
    %cst_147 = arith.constant 5.000000e-01 : f32
    %449 = vector.broadcast %cst_147 : f32 to vector<8x32xf32>
    %450 = arith.mulf %449, %448 : vector<8x32xf32>
    %cst_148 = arith.constant 0.000000e+00 : f32
    %451 = vector.broadcast %cst_148 : f32 to vector<8x1xf32>
    %452 = arith.cmpf ogt, %393, %451 : vector<8x1xf32>
    %cst_149 = arith.constant 0xFF800000 : f32
    %453 = vector.shape_cast %452 : vector<8x1xi1> to vector<8x1xi1>
    %454 = vector.broadcast %453 : vector<8x1xi1> to vector<8x32xi1>
    %455 = vector.broadcast %cst_149 : f32 to vector<8x32xf32>
    %456 = arith.select %454, %450, %455 : vector<8x32xi1>, vector<8x32xf32>
    %457 = arith.maximumf %392, %456 : vector<8x32xf32>
    %c8_150 = arith.constant 8 : index
    %c0_151 = arith.constant 0 : index
    %458 = vector.load %arg10[%c8_150, %c0_151] : memref<64x32xf32, #tpu.memory_space<vmem>>, vector<8x32xf32>
    %459 = arith.addf %458, %446 : vector<8x32xf32>
    %cst_152 = arith.constant 5.000000e-01 : f32
    %460 = vector.broadcast %cst_152 : f32 to vector<8x32xf32>
    %461 = arith.mulf %460, %459 : vector<8x32xf32>
    %cst_153 = arith.constant 0.000000e+00 : f32
    %462 = vector.broadcast %cst_153 : f32 to vector<8x1xf32>
    %463 = arith.cmpf ogt, %394, %462 : vector<8x1xf32>
    %cst_154 = arith.constant 0xFF800000 : f32
    %464 = vector.shape_cast %463 : vector<8x1xi1> to vector<8x1xi1>
    %465 = vector.broadcast %464 : vector<8x1xi1> to vector<8x32xi1>
    %466 = vector.broadcast %cst_154 : f32 to vector<8x32xf32>
    %467 = arith.select %465, %461, %466 : vector<8x32xi1>, vector<8x32xf32>
    %468 = arith.maximumf %457, %467 : vector<8x32xf32>
    %c56_155 = arith.constant 56 : index
    %c0_156 = arith.constant 0 : index
    %469 = vector.load %arg1[%c56_155, %c0_156] : memref<64x1xf32, #tpu.memory_space<vmem>>, vector<8x1xf32>
    %c0_157 = arith.constant 0 : index
    %c0_158 = arith.constant 0 : index
    %470 = vector.load %arg1[%c0_157, %c0_158] : memref<64x1xf32, #tpu.memory_space<vmem>>, vector<8x1xf32>
    %c56_159 = arith.constant 56 : index
    %c0_160 = arith.constant 0 : index
    %471 = vector.load %arg8[%c56_159, %c0_160] : memref<64x96xf32, #tpu.memory_space<vmem>>, vector<8x96xf32>
    %c0_161 = arith.constant 0 : index
    %c0_162 = arith.constant 0 : index
    %472 = vector.load %arg9[%c0_161, %c0_162] : memref<64x96xf32, #tpu.memory_space<vmem>>, vector<8x96xf32>
    %cst_163 = arith.constant dense<0.000000e+00> : vector<8x96xf32>
    %473 = tpu.matmul %422, %0, %cst_163 {dimension_numbers = #tpu.dot_dimension_numbers<[1], [0], [0], [1], [0, 0, 1, 1], [], []>} : vector<8x32xf32>, vector<32x96xf32>, vector<8x96xf32> -> vector<8x96xf32>
    %cst_164 = arith.constant dense<0.000000e+00> : vector<8x96xf32>
    %474 = tpu.matmul %446, %1, %cst_164 {dimension_numbers = #tpu.dot_dimension_numbers<[1], [0], [0], [1], [0, 0, 1, 1], [], []>} : vector<8x32xf32>, vector<32x96xf32>, vector<8x96xf32> -> vector<8x96xf32>
    %475 = vector.extract_strided_slice %471 {offsets = [0, 0], sizes = [8, 64], strides = [1, 1]} : vector<8x96xf32> to vector<8x64xf32>
    %476 = vector.extract_strided_slice %473 {offsets = [0, 0], sizes = [8, 64], strides = [1, 1]} : vector<8x96xf32> to vector<8x64xf32>
    %477 = arith.addf %475, %476 : vector<8x64xf32>
    %478 = arith.negf %477 : vector<8x64xf32>
    %479 = math.exp %478 : vector<8x64xf32>
    %cst_165 = arith.constant 1.000000e+00 : f32
    %480 = vector.broadcast %cst_165 : f32 to vector<8x64xf32>
    %481 = arith.addf %480, %479 : vector<8x64xf32>
    %482 = arith.divf %480, %481 : vector<8x64xf32>
    %483 = vector.extract_strided_slice %471 {offsets = [0, 64], sizes = [8, 32], strides = [1, 1]} : vector<8x96xf32> to vector<8x32xf32>
    %484 = vector.extract_strided_slice %482 {offsets = [0, 0], sizes = [8, 32], strides = [1, 1]} : vector<8x64xf32> to vector<8x32xf32>
    %485 = vector.extract_strided_slice %473 {offsets = [0, 64], sizes = [8, 32], strides = [1, 1]} : vector<8x96xf32> to vector<8x32xf32>
    %486 = vector.broadcast %2 : vector<1x32xf32> to vector<8x32xf32>
    %487 = arith.addf %485, %486 : vector<8x32xf32>
    %488 = arith.mulf %484, %487 : vector<8x32xf32>
    %489 = arith.addf %483, %488 : vector<8x32xf32>
    %490 = math.tanh %489 : vector<8x32xf32>
    %491 = vector.extract_strided_slice %482 {offsets = [0, 32], sizes = [8, 32], strides = [1, 1]} : vector<8x64xf32> to vector<8x32xf32>
    %cst_166 = arith.constant 1.000000e+00 : f32
    %492 = vector.broadcast %cst_166 : f32 to vector<8x32xf32>
    %493 = arith.subf %492, %491 : vector<8x32xf32>
    %494 = vector.broadcast %469 : vector<8x1xf32> to vector<8x32xf32>
    %495 = arith.mulf %494, %493 : vector<8x32xf32>
    %496 = arith.subf %490, %422 : vector<8x32xf32>
    %497 = arith.mulf %495, %496 : vector<8x32xf32>
    %498 = arith.addf %422, %497 : vector<8x32xf32>
    %499 = vector.extract_strided_slice %472 {offsets = [0, 0], sizes = [8, 64], strides = [1, 1]} : vector<8x96xf32> to vector<8x64xf32>
    %500 = vector.extract_strided_slice %474 {offsets = [0, 0], sizes = [8, 64], strides = [1, 1]} : vector<8x96xf32> to vector<8x64xf32>
    %501 = arith.addf %499, %500 : vector<8x64xf32>
    %502 = arith.negf %501 : vector<8x64xf32>
    %503 = math.exp %502 : vector<8x64xf32>
    %cst_167 = arith.constant 1.000000e+00 : f32
    %504 = vector.broadcast %cst_167 : f32 to vector<8x64xf32>
    %505 = arith.addf %504, %503 : vector<8x64xf32>
    %506 = arith.divf %504, %505 : vector<8x64xf32>
    %507 = vector.extract_strided_slice %472 {offsets = [0, 64], sizes = [8, 32], strides = [1, 1]} : vector<8x96xf32> to vector<8x32xf32>
    %508 = vector.extract_strided_slice %506 {offsets = [0, 0], sizes = [8, 32], strides = [1, 1]} : vector<8x64xf32> to vector<8x32xf32>
    %509 = vector.extract_strided_slice %474 {offsets = [0, 64], sizes = [8, 32], strides = [1, 1]} : vector<8x96xf32> to vector<8x32xf32>
    %510 = vector.broadcast %3 : vector<1x32xf32> to vector<8x32xf32>
    %511 = arith.addf %509, %510 : vector<8x32xf32>
    %512 = arith.mulf %508, %511 : vector<8x32xf32>
    %513 = arith.addf %507, %512 : vector<8x32xf32>
    %514 = math.tanh %513 : vector<8x32xf32>
    %515 = vector.extract_strided_slice %506 {offsets = [0, 32], sizes = [8, 32], strides = [1, 1]} : vector<8x64xf32> to vector<8x32xf32>
    %cst_168 = arith.constant 1.000000e+00 : f32
    %516 = vector.broadcast %cst_168 : f32 to vector<8x32xf32>
    %517 = arith.subf %516, %515 : vector<8x32xf32>
    %518 = vector.broadcast %470 : vector<8x1xf32> to vector<8x32xf32>
    %519 = arith.mulf %518, %517 : vector<8x32xf32>
    %520 = arith.subf %514, %446 : vector<8x32xf32>
    %521 = arith.mulf %519, %520 : vector<8x32xf32>
    %522 = arith.addf %446, %521 : vector<8x32xf32>
    %c56_169 = arith.constant 56 : index
    %c0_170 = arith.constant 0 : index
    %523 = vector.load %arg11[%c56_169, %c0_170] : memref<64x32xf32, #tpu.memory_space<vmem>>, vector<8x32xf32>
    %524 = arith.addf %498, %523 : vector<8x32xf32>
    %cst_171 = arith.constant 5.000000e-01 : f32
    %525 = vector.broadcast %cst_171 : f32 to vector<8x32xf32>
    %526 = arith.mulf %525, %524 : vector<8x32xf32>
    %cst_172 = arith.constant 0.000000e+00 : f32
    %527 = vector.broadcast %cst_172 : f32 to vector<8x1xf32>
    %528 = arith.cmpf ogt, %469, %527 : vector<8x1xf32>
    %cst_173 = arith.constant 0xFF800000 : f32
    %529 = vector.shape_cast %528 : vector<8x1xi1> to vector<8x1xi1>
    %530 = vector.broadcast %529 : vector<8x1xi1> to vector<8x32xi1>
    %531 = vector.broadcast %cst_173 : f32 to vector<8x32xf32>
    %532 = arith.select %530, %526, %531 : vector<8x32xi1>, vector<8x32xf32>
    %533 = arith.maximumf %468, %532 : vector<8x32xf32>
    %c0_174 = arith.constant 0 : index
    %c0_175 = arith.constant 0 : index
    %534 = vector.load %arg10[%c0_174, %c0_175] : memref<64x32xf32, #tpu.memory_space<vmem>>, vector<8x32xf32>
    %535 = arith.addf %534, %522 : vector<8x32xf32>
    %cst_176 = arith.constant 5.000000e-01 : f32
    %536 = vector.broadcast %cst_176 : f32 to vector<8x32xf32>
    %537 = arith.mulf %536, %535 : vector<8x32xf32>
    %cst_177 = arith.constant 0.000000e+00 : f32
    %538 = vector.broadcast %cst_177 : f32 to vector<8x1xf32>
    %539 = arith.cmpf ogt, %470, %538 : vector<8x1xf32>
    %cst_178 = arith.constant 0xFF800000 : f32
    %540 = vector.shape_cast %539 : vector<8x1xi1> to vector<8x1xi1>
    %541 = vector.broadcast %540 : vector<8x1xi1> to vector<8x32xi1>
    %542 = vector.broadcast %cst_178 : f32 to vector<8x32xf32>
    %543 = arith.select %541, %537, %542 : vector<8x32xi1>, vector<8x32xf32>
    %544 = arith.maximumf %533, %543 : vector<8x32xf32>
    %c0_179 = arith.constant 0 : index
    %c0_180 = arith.constant 0 : index
    %545 = vector.load %arg6[%c0_179, %c0_180] : memref<32x8xf32, #tpu.memory_space<vmem>>, vector<32x8xf32>
    %cst_181 = arith.constant dense<0.000000e+00> : vector<8x8xf32>
    %546 = tpu.matmul %544, %545, %cst_181 {dimension_numbers = #tpu.dot_dimension_numbers<[1], [0], [0], [1], [0, 0, 1, 1], [], []>} : vector<8x32xf32>, vector<32x8xf32>, vector<8x8xf32> -> vector<8x8xf32>
    %c0_182 = arith.constant 0 : index
    %c256 = arith.constant 256 : index
    %547 = vector.load %arg5[%c0_182, %c256] : memref<1x264xf32, #tpu.memory_space<vmem>>, vector<1x8xf32>
    %548 = vector.broadcast %547 : vector<1x8xf32> to vector<8x8xf32>
    %549 = arith.addf %546, %548 : vector<8x8xf32>
    %c0_183 = arith.constant 0 : index
    %c0_184 = arith.constant 0 : index
    %550 = vector.load %arg7[%c0_183, %c0_184] : memref<8x8xf32, #tpu.memory_space<vmem>>, vector<8x8xf32>
    tpu.vector_store %arg7[%c0_183, %c0_184], %549 {strides = array<i32>} : memref<8x8xf32, #tpu.memory_space<vmem>>, vector<8x8xf32>,
    return
  }
}

</mosaic_0001>

<bundles_post_ra>
// kernel: run_selection.1
= control target key start
LH: loop header
LB: loop body
LE: loop exit
PB: predicated region body
PF: predicated region fallthrough
CT: control target
= control target key end

     0   :  { %v2884_v7 = vmov 0.0   ;;  %v2885_v8 = vmov 0.0|0.0   ;;  %vm2886_vm0 = vmmov 0   ;;  %vm64_vm1 = vcmask 261120   ;;  %s3549_s0 = inlined_call_operand.vmem [shape: f32[64,32], index: 0, kind: input, shape index: {}]   ;;  %s3550_s1 = inlined_call_operand.vmem [shape: f32[64,1], index: 1, kind: input, shape index: {}]   ;;  %s3551_s2 = inlined_call_operand.vmem [shape: f32[32,192], index: 2, kind: input, shape index: {}]   ;;  %s3552_s3 = inlined_call_operand.vmem [shape: f32[32,96], index: 3, kind: input, shape index: {}]   ;;  %s3553_s4 = inlined_call_operand.vmem [shape: f32[32,96], index: 4, kind: input, shape index: {}]   ;;  %s3554_s5 = inlined_call_operand.vmem [shape: f32[1,264], index: 5, kind: input, shape index: {}]   ;;  %s3555_s6 = inlined_call_operand.vmem [shape: f32[32,8], index: 6, kind: input, shape index: {}]   ;;  %s3556_s7 = inlined_call_operand.hbm [shape: f32[8,8], index: 7, kind: output, shape index: {}]  }
   0x1   :  { %v45_v0 = vld [vmem:[%s3551_s2 + $0x8] sm:$0xff]  ;;  %v47_v1 = vld [vmem:[%s3551_s2 + $0x18] sm:$0xff]  ;;  %v44_v2 = vld [vmem:[%s3551_s2] sm:$0xff]  ;;  %153 = vmatprep.mubr.f32.mxu0 %v2884_v7  ;;  %2650 = vmatprep.subr.bf16.mxu1 %v2885_v8 }
   0x2   :  { %v2642_v3 = vpack.c.bf16 %v47_v1, %v45_v0  ;;  %v46_v4 = vld [vmem:[%s3551_s2 + $0x10] sm:$0xff]  ;;  %v49_v5 = vld [vmem:[%s3551_s2 + $0x28] sm:$0xff]  ;;  %v51_v6 = vld [vmem:[%s3551_s2 + $0x38] sm:$0xff]  ;;  %2463 = vmatprep.mubr.msk.f32.mxu1 %vm2886_vm0, %v2884_v7 }
   0x3   :  { %v2644_v9 = vpack.c.bf16 %v46_v4, %v44_v2  ;;  %v2646_v10 = vpack.c.bf16 %v51_v6, %v49_v5  ;;  %v48_v11 = vld [vmem:[%s3551_s2 + $0x20] sm:$0xff]  ;;  %v50_v12 = vld [vmem:[%s3551_s2 + $0x30] sm:$0xff]  ;;  %v28_v14 = vld [vmem:[%s3552_s3 + $0x8] sm:$0xff] }
   0x4   :  { %2643 = vmatprep.subr.bf16.mxu0 %v2642_v3  ;;  %v27_v13 = vld [vmem:[%s3552_s3] sm:$0xff]  ;;  %v2648_v15 = vpack.c.bf16 %v50_v12, %v48_v11  ;;  %v29_v17 = vld [vmem:[%s3552_s3 + $0x10] sm:$0xff]  ;;  %v30_v18 = vld [vmem:[%s3552_s3 + $0x18] sm:$0xff] }
   0x5   :  { %2645 = vmatpush1.bf16.msra.mxu0 %v2644_v9  ;;  %v2966_v16 = vpack.c.bf16 %v28_v14, %v27_v13  ;;  %v2975_v19 = vpack.c.bf16 %v30_v18, %v29_v17  ;;  %v31_v20 = vld [vmem:[%s3553_s4] sm:$0xff]  ;;  %v32_v21 = vld [vmem:[%s3553_s4 + $0x8] sm:$0xff] }
   0x6   :  { %2647 = vmatprep.subr.bf16.mxu0 %v2646_v10  ;;  %v36_v22 = vld [vmem:[%s3549_s0] sm:$0xff] }
   0x7   :  { %2652 = vmatpush3.bf16.msra.mxu1 %v2966_v16  ;;  %v2990_v23 = vld [vmem:[%s3554_s5 + $0x1] ss:$0 sm:$0xff] }
   0x8   :  { %2653 = vmatprep.subr.bf16.mxu1 %v2885_v8 }
   0x9   :  { %2649 = vmatpush1.bf16.msra.mxu0 %v2648_v15 }
   0xa   :  { %12 = vsyncpa [#allocation7], 0  ;;  %s2887_s8 = smov 96   ;;  %2674 = vmatprep.subr.bf16.mxu0 %v2885_v8  ;;  %v2996_v24 = vpack.c.bf16 %v32_v21, %v31_v20  ;;  %v33_v25 = vld [vmem:[%s3553_s4 + $0x10] sm:$0xff]  ;;  %v34_v26 = vld [vmem:[%s3553_s4 + $0x18] sm:$0xff]  ;;  %v54_v35 = vlaneseq  ;;  %vm202_vm2 = vcmask 785408  }
   0xb   :  { %475 = vrot.lane.b32.xlu0 %v2990_v23, %s2887_s8  ;;  %2655 = vmatpush3.bf16.msra.mxu1 %v2975_v19  ;;  %v37_v27 = vld [vmem:[%s3549_s0 + $0x8] sm:$0xff]  ;;  %v3014_v28 = vpack.c.bf16 %v34_v26, %v33_v25  ;;  %v38_v29 = vld [vmem:[%s3549_s0 + $0x10] sm:$0xff]  ;;  %v39_v30 = vld [vmem:[%s3549_s0 + $0x18] sm:$0xff]  ;;  %v2888_v12 = vmov 0   ;;  %s2890_s27 = smov 64   ;;  %s2891_s11 = smov [#allocation6]  }
   0xc   :  { %2329 = vmatmul.mubr.msk.f32.vlgmr.msra.gmra.mrb[0].mxu0 %vm64_vm1, %v36_v22  ;;  %2656 = vmatprep.subr.bf16.mxu1 %v2885_v8  ;;  %v40_v31 = vld [vmem:[%s3549_s0 + $0x20] sm:$0xff]  ;;  %v41_v32 = vld [vmem:[%s3549_s0 + $0x28] sm:$0xff]  ;;  %v42_v33 = vld [vmem:[%s3549_s0 + $0x30] sm:$0xff]  ;;  %v55_v36 = vshrl.u32 %v54_v35, 7  ;;  %s2321_s12 = sshll.u32 %s2891_s11, 4  ;;  %s2322_s12 = int_to_ptr.vmem [resolvable:$true] %s2321_s12 }
   0xd   :  { %159 = vmatprep.mubr.f32.mxu0 %v2884_v7  ;;  %2676 = vmatpush3.bf16.msra.mxu0 %v2966_v16  ;;  %v43_v34 = vld [vmem:[%s3549_s0 + $0x38] sm:$0xff]  ;;  %v52_v38 = vld [vmem:[%s3554_s5] sm:$0x3]  ;;  %s2889_s0 = smov 32   ;;  %s2860_s13 = scalar_lea.vmem %s2322_s12, 128 }
   0xe   :  { %2464 = vmatmul.mubr.f32.vlgmr.msra.gmra.mrb[0].mxu1 %v2884_v7  ;;  %2677 = vmatprep.subr.bf16.mxu0 %v2885_v8  ;;  %v56_v37 = vsub.s32 0, %v55_v36  ;;  %v60_v39 = vsub.s32 1, %v55_v36  ;;  %v283_v36 = vld [vmem:[%s3550_s1] sm:$0xff]  ;;  %p2861_p0 = scmp.ne.s32.totalorder %s2322_s12, %s2860_s13  ;;  %p2865_p1 = scmp.lt.s32.totalorder %s2322_s12, %s2322_s12 }
   0xf   :  { %2658 = vmatpush3.bf16.msra.mxu1 %v2996_v24  ;;  %2474 = vmatprep.mubr.msk.f32.mxu1 %vm2886_vm0, %v2884_v7  ;;  %p2866_p2 = scmp.lt.s32.totalorder %s2860_s13, %s2860_s13 }
  0x10   :  { %2330 = vmatmul.mubr.msk.f32.gmra.mrb[2].mxu0 %vm64_vm1, %v37_v27  ;;  %2659 = vmatprep.subr.bf16.mxu1 %v2885_v8  ;;  %v57_v40 = vrot.slane %v52_v38, %v56_v37  ;;  %v61_v41 = vrot.slane %v52_v38, %v60_v39 }
  0x11   :  { %165 = vmatprep.mubr.f32.mxu0 %v2884_v7  ;;  %2679 = vmatpush3.bf16.msra.mxu0 %v2975_v19  ;;  %p2867_p3 = por %p2866_p2, %p2865_p1 }
  0x12   :  { %2686 = vmatprep.subr.bf16.mxu0 %v2885_v8  ;;  %2760 = vset.pattern.permute.xlu1 %v2888_v12 }
  0x13   :  { %2661 = vmatpush3.bf16.msra.mxu1 %v3014_v28  ;;  %2761 = vset.pattern.permute.xlu0 %v2888_v12  ;;  %p2868_p4 = pnand %p2867_p3, %p2861_p0 }
  0x14   :  { %2331 = vmatmul.mubr.msk.f32.gmra.mrb[4].mxu0 %vm64_vm1, %v38_v29  ;;  %2662 = vmatprep.subr.bf16.mxu1 %v2885_v8 }
  0x15   :  { %171 = vmatprep.mubr.f32.mxu0 %v2884_v7 }
  0x16   :  { %2475 = vmatmul.mubr.f32.vlgmr.msra.gmra.mrb[2].mxu1 %v2884_v7 }
  0x17   :  { %2664 = vmatpush3.bf16.msra.mxu1 %v2966_v16  ;;  %2485 = vmatprep.mubr.msk.f32.mxu1 %vm2886_vm0, %v2884_v7 }
  0x18   :  { %2332 = vmatmul.mubr.msk.f32.gmra.mrb[6].mxu0 %vm64_vm1, %v39_v30  ;;  %2665 = vmatprep.subr.bf16.mxu1 %v2885_v8 }
  0x19   :  { %177 = vmatprep.mubr.f32.mxu0 %v2884_v7 }
  0x1b   :  { %2667 = vmatpush3.bf16.msra.mxu1 %v2975_v19 }
  0x1c   :  { %2333 = vmatmul.mubr.msk.f32.gmra.mrb[8].mxu0 %vm64_vm1, %v40_v31  ;;  %2668 = vmatprep.subr.bf16.mxu1 %v2885_v8 }
  0x1d   :  { %183 = vmatprep.mubr.f32.mxu0 %v2884_v7 }
  0x20   :  { %2334 = vmatmul.mubr.msk.f32.gmra.mrb[10].mxu0 %vm64_vm1, %v41_v32 }
  0x21   :  { %189 = vmatprep.mubr.f32.mxu0 %v2884_v7 }
  0x24   :  { %2335 = vmatmul.mubr.msk.f32.gmra.mrb[12].mxu0 %vm64_vm1, %v42_v33 }
  0x25   :  { %195 = vmatprep.mubr.f32.mxu0 %v2884_v7 }
  0x28   :  { %2336 = vmatmul.mubr.msk.f32.gmra.mrb[14].mxu0 %vm64_vm1, %v43_v34 }
  0x29   :  { %2507 = vmatprep.mubr.msk.f32.mxu0 %vm2886_vm0, %v2884_v7 }
  0x7d   :  { %v3110_v14 = vpop.permute.xlu0 %475 }
  0xdf   :  { %v155_v42 = vpop.f32.mrb[0].mxu0 }
  0xe0   :  { %v3066_v43 = vadd.f32 %v155_v42, %v57_v40  ;;  %v157_v44 = vpop.f32.mrb[1].mxu0 }
  0xe1   :  { %v3068_v45 = vadd.f32 %v157_v44, %v61_v41  ;;  %v356_v46 = vpop.f32.mrb[0].mxu1 }
  0xe2   :  { %203 = vst.msk [vmem:[#allocation2] sm:$0xff] %vm202_vm2, %v3066_v43  ;;  %v2465_v47 = vpop.f32.mrb[1].mxu1  ;;  %v443_v21 = vadd.f32 %v2990_v23, %v356_v46 }
  0xe3   :  { %v161_v48 = vpop.f32.mrb[2].mxu0  ;;  %v284_v47 = vld [vmem:[%s3550_s1 + $0x38] sm:$0xff] }
  0xe4   :  { %v3072_v49 = vadd.f32 %v161_v48, %v57_v40  ;;  %v163_v50 = vpop.f32.mrb[3].mxu0 }
  0xe5   :  { %v3074_v51 = vadd.f32 %v163_v50, %v61_v41 }
  0xe6   :  { %204 = vst.msk [vmem:[#allocation2 + $0x8] sm:$0xff] %vm202_vm2, %v3072_v49 }
  0xe7   :  { %v167_v52 = vpop.f32.mrb[4].mxu0 }
  0xe8   :  { %v3078_v53 = vadd.f32 %v167_v52, %v57_v40  ;;  %v169_v54 = vpop.f32.mrb[5].mxu0 }
  0xe9   :  { %v3080_v55 = vadd.f32 %v169_v54, %v61_v41  ;;  %v426_v56 = vpop.f32.mrb[2].mxu1  ;;  %v285_v22 = vld [vmem:[#allocation2] sm:$0xff] }
  0xea   :  { %205 = vst.msk [vmem:[#allocation2 + $0x10] sm:$0xff] %vm202_vm2, %v3078_v53  ;;  %v2476_v57 = vpop.f32.mrb[3].mxu1  ;;  %v478_v20 = vadd.f32 %v3110_v14, %v426_v56  ;;  %v430_v25 = vadd.f32 %v356_v46, %v285_v22 }
  0xeb   :  { %v173_v58 = vpop.f32.mrb[6].mxu0 }
  0xec   :  { %v3084_v59 = vadd.f32 %v173_v58, %v57_v40  ;;  %v175_v60 = vpop.f32.mrb[7].mxu0  ;;  %v2337_v26 = vmul.f32 -1.442695, %v430_v25 }
  0xed   :  { %v3086_v61 = vadd.f32 %v175_v60, %v61_v41 }
  0xee   :  { %206 = vst.msk [vmem:[#allocation2 + $0x18] sm:$0xff] %vm202_vm2, %v3084_v59  ;;  %2762 = vpow2.f32 %v2337_v26 }
  0xef   :  { %v179_v62 = vpop.f32.mrb[8].mxu0 }
  0xf0   :  { %v3090_v63 = vadd.f32 %v179_v62, %v57_v40  ;;  %v181_v0 = vpop.f32.mrb[9].mxu0 }
  0xf1   :  { %v3092_v1 = vadd.f32 %v181_v0, %v61_v41 }
  0xf2   :  { %207 = vst.msk [vmem:[#allocation2 + $0x20] sm:$0xff] %vm202_vm2, %v3090_v63 }
  0xf3   :  { %v185_v2 = vpop.f32.mrb[10].mxu0 }
  0xf4   :  { %v3096_v3 = vadd.f32 %v185_v2, %v57_v40  ;;  %v187_v4 = vpop.f32.mrb[11].mxu0 }
  0xf5   :  { %v3098_v5 = vadd.f32 %v187_v4, %v61_v41 }
  0xf6   :  { %208 = vst.msk [vmem:[#allocation2 + $0x28] sm:$0xff] %vm202_vm2, %v3096_v3 }
  0xf7   :  { %v191_v6 = vpop.f32.mrb[12].mxu0 }
  0xf8   :  { %v3102_v9 = vadd.f32 %v191_v6, %v57_v40  ;;  %v193_v10 = vpop.f32.mrb[13].mxu0  ;;  %v2763_v27 = vpop.eup %2762 }
  0xf9   :  { %v3104_v11 = vadd.f32 %v193_v10, %v61_v41  ;;  %v434_v29 = vadd.f32 1.0, %v2763_v27 }
  0xfa   :  { %209 = vst.msk [vmem:[#allocation2 + $0x30] sm:$0xff] %vm202_vm2, %v3102_v9 }
  0xfb   :  { %v197_v13 = vpop.f32.mrb[14].mxu0  ;;  %2764 = vrcp.f32 %v434_v29  ;;  %v3168_v29 = vld [vmem:[%s3550_s1 + $0x30] sm:$0xff] }
  0xfc   :  { %v198_v15 = vadd.f32 %v197_v13, %v57_v40  ;;  %v199_v17 = vpop.f32.mrb[15].mxu0 }
  0xfd   :  { %v200_v18 = vadd.f32 %v199_v17, %v61_v41 }
  0xfe   :  { %210 = vst.msk [vmem:[#allocation2 + $0x38] sm:$0xff] %vm202_vm2, %v198_v15  ;;  %255 = vrot.lane.b32.xlu0 %v198_v15, %s2889_s0 }
  0xff   :  { %257 = vrot.lane.b32.xlu1 %v200_v18, %s2889_s0 }
 0x102   :  { %480 = vrot.lane.b32.xlu0 %v478_v20, %s2890_s27 }
 0x103   :  { %445 = vrot.lane.b32.xlu1 %v443_v21, %s2890_s27 }
 0x105   :  { %v2765_v33 = vpop.eup %2764 }
 0x106   :  { %v455_v60 = vsub.f32 1.0, %v2765_v33 }
 0x170   :  { %v256_v30 = vpop.permute.xlu0 %255 }
 0x171   :  { %v258_v31 = vpop.permute.xlu1 %257 }
 0x172   :  { %v266_v32 = vsel %vm64_vm1, %v256_v30, %v258_v31 }
 0x173   :  { %282 = vst.msk [vmem:[#allocation3 + $0x38] sm:$0xff] %vm202_vm2, %v266_v32 }
 0x174   :  { %v481_v42 = vpop.permute.xlu0 %480 }
 0x175   :  { %v446_v34 = vpop.permute.xlu1 %445 }
 0x176   :  { %v448_v35 = vmul.f32 %v2765_v33, %v446_v34 }
 0x178   :  { %450 = vrot.lane.b32.xlu1 %v448_v35, %s2890_s27 }
 0x17a   :  { %v286_v37 = vld [vmem:[#allocation3 + $0x38] sm:$0xff] }
 0x17b   :  { %v468_v38 = vadd.f32 %v426_v56, %v286_v37 }
 0x17c   :  { %458 = vperm.xlu1 %2760, %v283_v36  }
 0x17d   :  { %v2339_v39 = vmul.f32 -1.442695, %v468_v38 }
 0x17f   :  { %2766 = vpow2.f32 %v2339_v39  ;;  %v515_v39 = vld [vmem:[#allocation2 + $0x8] sm:$0xff] }
 0x189   :  { %v2767_v40 = vpop.eup %2766 }
 0x18a   :  { %v472_v41 = vadd.f32 1.0, %v2767_v40 }
 0x18c   :  { %2768 = vrcp.f32 %v472_v41 }
 0x196   :  { %v2769_v44 = vpop.eup %2768 }
 0x197   :  { %v483_v46 = vmul.f32 %v2769_v44, %v481_v42  ;;  %v490_v6 = vsub.f32 1.0, %v2769_v44 }
 0x199   :  { %485 = vrot.lane.b32.xlu0 %v483_v46, %s2890_s27 }
 0x19d   :  { %493 = vperm.xlu0 %2761, %v284_v47  }
 0x1ea   :  { %v451_v48 = vpop.permute.xlu1 %450 }
 0x1eb   :  { %v453_v50 = vadd.f32 %v451_v48, %v285_v22 }
 0x1ed   :  { %2770 = vtanh.f32 %v453_v50 }
 0x1f7   :  { %v2771_v52 = vpop.eup %2770 }
 0x1f8   :  { %463 = vrot.lane.b32.xlu1 %v2771_v52, %s2887_s8 }
 0x1fb   :  { %v459_v58 = vpop.permute.xlu1 %458 }
 0x1fc   :  { %v461_v62 = vmul.f32 %v459_v58, %v455_v60  ;;  %v3181_v58 = vld [vmem:[%s3550_s1 + $0x8] sm:$0xff] }
 0x1fd   :  { %vm1958_vm5 = vcmp.gt.f32.partialorder %v3181_v58, 0.0 }
 0x20b   :  { %v486_v54 = vpop.permute.xlu0 %485 }
 0x20c   :  { %v488_v56 = vadd.f32 %v486_v54, %v286_v37 }
 0x20e   :  { %2772 = vtanh.f32 %v488_v56 }
 0x218   :  { %v2773_v57 = vpop.eup %2772 }
 0x219   :  { %498 = vrot.lane.b32.xlu1 %v2773_v57, %s2887_s8 }
 0x21c   :  { %v494_v4 = vpop.permute.xlu0 %493 }
 0x21d   :  { %v496_v10 = vmul.f32 %v494_v4, %v490_v6 }
 0x26a   :  { %v464_v0 = vpop.permute.xlu1 %463 }
 0x26b   :  { %v3131_v2 = vmul.f32 %v464_v0, %v461_v62 }
 0x26d   :  { %504 = vrot.lane.b32.xlu0 %v3131_v2, %s2887_s8 }
 0x271   :  { %251 = vrot.lane.b32.xlu0 %v3102_v9, %s2889_s0 }
 0x28b   :  { %v499_v13 = vpop.permute.xlu1 %498 }
 0x28c   :  { %v3137_v15 = vmul.f32 %v499_v13, %v496_v10 }
 0x28e   :  { %509 = vrot.lane.b32.xlu1 %v3137_v15, %s2887_s8 }
 0x292   :  { %253 = vrot.lane.b32.xlu1 %v3104_v11, %s2889_s0 }
 0x2df   :  { %v505_v17 = vpop.permute.xlu0 %504 }
 0x2e0   :  { %507 = vst.msk [vmem:[#allocation4] sm:$0xff] %vm64_vm1, %v505_v17  ;;  %2486 = vmatmul.mubr.msk.f32.vlgmr.msra.gmra.mrb[4].mxu1 %vm64_vm1, %v505_v17 }
 0x2e1   :  { %2670 = vmatpush3.bf16.msra.mxu1 %v2996_v24  ;;  %2496 = vmatprep.mubr.msk.f32.mxu1 %vm2886_vm0, %v2884_v7 }
 0x2e2   :  { %2671 = vmatprep.subr.bf16.mxu1 %v2885_v8 }
 0x2e3   :  { %v252_v11 = vpop.permute.xlu0 %251 }
 0x2e5   :  { %2673 = vmatpush3.bf16.msra.mxu1 %v3014_v28 }
 0x2e6   :  { %2680 = vmatprep.subr.bf16.mxu1 %v2885_v8 }
 0x300   :  { %v510_v9 = vpop.permute.xlu1 %509 }
 0x301   :  { %512 = vst.msk [vmem:[#allocation5 + $0x38] sm:$0xff] %vm64_vm1, %v510_v9  ;;  %2497 = vmatmul.mubr.msk.f32.vlgmr.msra.gmra.mrb[6].mxu1 %vm64_vm1, %v510_v9 }
 0x302   :  { %2682 = vmatpush3.bf16.msra.mxu1 %v2996_v24  ;;  %2518 = vmatprep.mubr.msk.f32.mxu1 %vm2886_vm0, %v2884_v7 }
 0x303   :  { %2683 = vmatprep.subr.bf16.mxu1 %v2885_v8 }
 0x304   :  { %v254_v18 = vpop.permute.xlu1 %253 }
 0x305   :  { %v265_v20 = vsel %vm64_vm1, %v252_v11, %v254_v18 }
 0x306   :  { %281 = vst.msk [vmem:[#allocation3 + $0x30] sm:$0xff] %vm202_vm2, %v265_v20  ;;  %2685 = vmatpush3.bf16.msra.mxu1 %v3014_v28 }
 0x307   :  { %2692 = vmatprep.subr.bf16.mxu1 %v2885_v8 }
 0x30d   :  { %v516_v30 = vld [vmem:[#allocation3 + $0x30] sm:$0xff] }
 0x3b3   :  { %v585_v21 = vpop.f32.mrb[4].mxu1 }
 0x3b4   :  { %v2487_v22 = vpop.f32.mrb[5].mxu1  ;;  %v668_v38 = vadd.f32 %v2990_v23, %v585_v21  ;;  %v661_v40 = vadd.f32 %v585_v21, %v515_v39 }
 0x3b6   :  { %v2342_v41 = vmul.f32 -1.442695, %v661_v40 }
 0x3d4   :  { %v657_v25 = vpop.f32.mrb[6].mxu1 }
 0x3d5   :  { %v704_v26 = vadd.f32 %v657_v25, %v3110_v14  ;;  %v2498_v27 = vpop.f32.mrb[7].mxu1  ;;  %v697_v31 = vadd.f32 %v657_v25, %v516_v30 }
 0x3d7   :  { %706 = vrot.lane.b32.xlu0 %v704_v26, %s2890_s27  ;;  %v2343_v32 = vmul.f32 -1.442695, %v697_v31 }
 0x3d9   :  { %2774 = vpow2.f32 %v2343_v32 }
 0x3db   :  { %723 = vrot.lane.b32.xlu0 %v3137_v15, %s2889_s0 }
 0x3df   :  { %719 = vperm.xlu0 %2761, %v3168_v29  }
 0x3e3   :  { %v2775_v33 = vpop.eup %2774 }
 0x3e4   :  { %v701_v34 = vadd.f32 1.0, %v2775_v33 }
 0x3e6   :  { %2776 = vrcp.f32 %v701_v34  ;;  %v3224_v34 = vld [vmem:[%s3550_s1 + $0x28] sm:$0xff] }
 0x3e7   :  { %2778 = vpow2.f32 %v2342_v41  ;;  %vm1686_vm8 = vcmp.gt.f32.partialorder %v3224_v34, 0.0 }
 0x3f0   :  { %v2777_v35 = vpop.eup %2776 }
 0x3f1   :  { %v2779_v42 = vpop.eup %2778  ;;  %v716_v4 = vsub.f32 1.0, %v2777_v35 }
 0x3f2   :  { %v665_v44 = vadd.f32 1.0, %v2779_v42 }
 0x3f4   :  { %2780 = vrcp.f32 %v665_v44 }
 0x3fe   :  { %v2781_v48 = vpop.eup %2780 }
 0x3ff   :  { %v680_v22 = vsub.f32 1.0, %v2781_v48 }
 0x449   :  { %v707_v36 = vpop.permute.xlu0 %706 }
 0x44a   :  { %v709_v37 = vmul.f32 %v2777_v35, %v707_v36 }
 0x44c   :  { %711 = vrot.lane.b32.xlu1 %v709_v37, %s2890_s27 }
 0x44d   :  { %v724_v56 = vpop.permute.xlu0 %723 }
 0x450   :  { %670 = vrot.lane.b32.xlu1 %v668_v38, %s2890_s27 }
 0x45e   :  { %v720_v60 = vpop.permute.xlu0 %719 }
 0x45f   :  { %v722_v6 = vmul.f32 %v720_v60, %v716_v4 }
 0x4be   :  { %v712_v46 = vpop.permute.xlu1 %711 }
 0x4bf   :  { %v714_v47 = vadd.f32 %v712_v46, %v516_v30 }
 0x4c1   :  { %2782 = vtanh.f32 %v714_v47 }
 0x4c2   :  { %v671_v50 = vpop.permute.xlu1 %670 }
 0x4c3   :  { %v673_v52 = vmul.f32 %v2781_v48, %v671_v50  ;;  %v745_v48 = vld [vmem:[#allocation2 + $0x10] sm:$0xff] }
 0x4c5   :  { %675 = vrot.lane.b32.xlu0 %v673_v52, %s2890_s27 }
 0x4cb   :  { %v2783_v54 = vpop.eup %2782 }
 0x4cc   :  { %v726_v57 = vsub.f32 %v2783_v54, %v724_v56 }
 0x4ce   :  { %728 = vrot.lane.b32.xlu1 %v726_v57, %s2887_s8 }
 0x4d2   :  { %687 = vrot.lane.b32.xlu1 %v3131_v2, %s2889_s0 }
 0x4d6   :  { %683 = vperm.xlu1 %2760, %v3181_v58  }
 0x537   :  { %v676_v62 = vpop.permute.xlu0 %675 }
 0x538   :  { %v678_v0 = vadd.f32 %v676_v62, %v515_v39 }
 0x53a   :  { %2784 = vtanh.f32 %v678_v0 }
 0x540   :  { %v729_v10 = vpop.permute.xlu1 %728 }
 0x541   :  { %v731_v13 = vmul.f32 %v729_v10, %v722_v6 }
 0x543   :  { %v3185_v17 = vadd.f32 %v731_v13, %v3137_v15 }
 0x544   :  { %v2785_v9 = vpop.eup %2784  ;;  %v688_v11 = vpop.permute.xlu1 %687 }
 0x545   :  { %739 = vrot.lane.b32.xlu0 %v3185_v17, %s2887_s8  ;;  %v690_v18 = vsub.f32 %v2785_v9, %v688_v11  ;;  %v3237_v9 = vld [vmem:[%s3550_s1 + $0x10] sm:$0xff] }
 0x546   :  { %vm1701_vm3 = vcmp.gt.f32.partialorder %v3237_v9, 0.0 }
 0x549   :  { %692 = vrot.lane.b32.xlu0 %v690_v18, %s2887_s8 }
 0x54d   :  { %247 = vrot.lane.b32.xlu0 %v3096_v3, %s2889_s0 }
 0x555   :  { %v684_v20 = vpop.permute.xlu1 %683 }
 0x556   :  { %v686_v15 = vmul.f32 %v684_v20, %v680_v22 }
 0x5b7   :  { %v740_v21 = vpop.permute.xlu0 %739 }
 0x5b8   :  { %742 = vst.msk [vmem:[#allocation5 + $0x30] sm:$0xff] %vm64_vm1, %v740_v21  ;;  %2519 = vmatmul.mubr.msk.f32.vlgmr.msra.gmra.mrb[8].mxu1 %vm64_vm1, %v740_v21 }
 0x5b9   :  { %2694 = vmatpush3.bf16.msra.mxu1 %v2996_v24  ;;  %2540 = vmatprep.mubr.msk.f32.mxu1 %vm2886_vm0, %v2884_v7 }
 0x5ba   :  { %2695 = vmatprep.subr.bf16.mxu1 %v2885_v8 }
 0x5bb   :  { %v693_v25 = vpop.permute.xlu0 %692 }
 0x5bc   :  { %v695_v26 = vmul.f32 %v693_v25, %v686_v15 }
 0x5bd   :  { %2697 = vmatpush3.bf16.msra.mxu1 %v3014_v28 }
 0x5be   :  { %v3200_v3 = vadd.f32 %v695_v26, %v3131_v2  ;;  %2704 = vmatprep.subr.bf16.mxu1 %v2885_v8 }
 0x5bf   :  { %v248_v2 = vpop.permute.xlu0 %247 }
 0x5c0   :  { %734 = vrot.lane.b32.xlu1 %v3200_v3, %s2887_s8 }
 0x5c4   :  { %249 = vrot.lane.b32.xlu1 %v3098_v5, %s2889_s0 }
 0x632   :  { %v735_v27 = vpop.permute.xlu1 %734 }
 0x633   :  { %737 = vst.msk [vmem:[#allocation4 + $0x8] sm:$0xff] %vm64_vm1, %v735_v27  ;;  %2508 = vmatmul.mubr.msk.f32.vlgmr.msra.gmra.mrb[16].mxu0 %vm64_vm1, %v735_v27 }
 0x634   :  { %2688 = vmatpush3.bf16.msra.mxu0 %v2966_v16  ;;  %2529 = vmatprep.mubr.msk.f32.mxu0 %vm2886_vm0, %v2884_v7 }
 0x635   :  { %2689 = vmatprep.subr.bf16.mxu0 %v2885_v8 }
 0x636   :  { %v250_v30 = vpop.permute.xlu1 %249 }
 0x637   :  { %v264_v31 = vsel %vm64_vm1, %v248_v2, %v250_v30 }
 0x638   :  { %280 = vst.msk [vmem:[#allocation3 + $0x28] sm:$0xff] %vm202_vm2, %v264_v31  ;;  %2691 = vmatpush3.bf16.msra.mxu0 %v2975_v19 }
 0x639   :  { %2698 = vmatprep.subr.bf16.mxu0 %v2885_v8 }
 0x63f   :  { %v746_v35 = vld [vmem:[#allocation3 + $0x28] sm:$0xff] }
 0x68b   :  { %v887_v5 = vpop.f32.mrb[8].mxu1 }
 0x68c   :  { %v934_v32 = vadd.f32 %v887_v5, %v3110_v14  ;;  %v2520_v33 = vpop.f32.mrb[9].mxu1  ;;  %v927_v36 = vadd.f32 %v887_v5, %v746_v35 }
 0x68e   :  { %936 = vrot.lane.b32.xlu0 %v934_v32, %s2890_s27  ;;  %v2347_v37 = vmul.f32 -1.442695, %v927_v36 }
 0x690   :  { %2786 = vpow2.f32 %v2347_v37 }
 0x692   :  { %953 = vrot.lane.b32.xlu0 %v3185_v17, %s2889_s0 }
 0x696   :  { %949 = vperm.xlu0 %2761, %v3224_v34  }
 0x69a   :  { %v2787_v38 = vpop.eup %2786 }
 0x69b   :  { %v931_v39 = vadd.f32 1.0, %v2787_v38 }
 0x69d   :  { %2788 = vrcp.f32 %v931_v39 }
 0x6a7   :  { %v2789_v40 = vpop.eup %2788 }
 0x6a8   :  { %v946_v21 = vsub.f32 1.0, %v2789_v40 }
 0x700   :  { %v937_v41 = vpop.permute.xlu0 %936 }
 0x701   :  { %v939_v42 = vmul.f32 %v2789_v40, %v937_v41  ;;  %v3280_v41 = vld [vmem:[%s3550_s1 + $0x20] sm:$0xff] }
 0x702   :  { %vm1430_vm7 = vcmp.gt.f32.partialorder %v3280_v41, 0.0 }
 0x703   :  { %941 = vrot.lane.b32.xlu1 %v939_v42, %s2890_s27 }
 0x704   :  { %v954_v10 = vpop.permute.xlu0 %953 }
 0x706   :  { %v815_v44 = vpop.f32.mrb[16].mxu0 }
 0x707   :  { %v898_v46 = vadd.f32 %v2990_v23, %v815_v44  ;;  %v2509_v47 = vpop.f32.mrb[17].mxu0  ;;  %v891_v50 = vadd.f32 %v815_v44, %v745_v48 }
 0x709   :  { %900 = vrot.lane.b32.xlu1 %v898_v46, %s2890_s27  ;;  %v2346_v52 = vmul.f32 -1.442695, %v891_v50 }
 0x70b   :  { %2790 = vpow2.f32 %v2346_v52 }
 0x715   :  { %v2791_v54 = vpop.eup %2790  ;;  %v950_v11 = vpop.permute.xlu0 %949 }
 0x716   :  { %v895_v56 = vadd.f32 1.0, %v2791_v54  ;;  %v952_v22 = vmul.f32 %v950_v11, %v946_v21 }
 0x718   :  { %2792 = vrcp.f32 %v895_v56 }
 0x722   :  { %v2793_v62 = vpop.eup %2792 }
 0x723   :  { %v910_v32 = vsub.f32 1.0, %v2793_v62 }
 0x775   :  { %v942_v57 = vpop.permute.xlu1 %941 }
 0x776   :  { %v944_v60 = vadd.f32 %v942_v57, %v746_v35 }
 0x778   :  { %2794 = vtanh.f32 %v944_v60 }
 0x77b   :  { %v901_v0 = vpop.permute.xlu1 %900 }
 0x77c   :  { %v903_v4 = vmul.f32 %v2793_v62, %v901_v0  ;;  %v975_v62 = vld [vmem:[#allocation2 + $0x18] sm:$0xff] }
 0x77e   :  { %905 = vrot.lane.b32.xlu0 %v903_v4, %s2890_s27 }
 0x782   :  { %v2795_v6 = vpop.eup %2794 }
 0x783   :  { %v956_v13 = vsub.f32 %v2795_v6, %v954_v10 }
 0x785   :  { %958 = vrot.lane.b32.xlu1 %v956_v13, %s2887_s8 }
 0x789   :  { %917 = vrot.lane.b32.xlu1 %v3200_v3, %s2889_s0 }
 0x78d   :  { %913 = vperm.xlu1 %2760, %v3237_v9  }
 0x7f0   :  { %v906_v18 = vpop.permute.xlu0 %905 }
 0x7f1   :  { %v908_v20 = vadd.f32 %v906_v18, %v745_v48 }
 0x7f3   :  { %2796 = vtanh.f32 %v908_v20 }
 0x7f7   :  { %v959_v15 = vpop.permute.xlu1 %958 }
 0x7f8   :  { %v961_v25 = vmul.f32 %v959_v15, %v952_v22 }
 0x7fa   :  { %v3241_v26 = vadd.f32 %v961_v25, %v3185_v17 }
 0x7fb   :  { %v918_v2 = vpop.permute.xlu1 %917 }
 0x7fc   :  { %969 = vrot.lane.b32.xlu0 %v3241_v26, %s2887_s8 }
 0x7fd   :  { %v2797_v27 = vpop.eup %2796 }
 0x7fe   :  { %v920_v30 = vsub.f32 %v2797_v27, %v918_v2  ;;  %v3293_v27 = vld [vmem:[%s3550_s1 + $0x18] sm:$0xff] }
 0x7ff   :  { %vm1444_vm4 = vcmp.gt.f32.partialorder %v3293_v27, 0.0 }
 0x800   :  { %922 = vrot.lane.b32.xlu0 %v920_v30, %s2887_s8 }
 0x804   :  { %243 = vrot.lane.b32.xlu0 %v3090_v63, %s2889_s0 }
 0x80c   :  { %v914_v31 = vpop.permute.xlu1 %913 }
 0x80d   :  { %v916_v17 = vmul.f32 %v914_v31, %v910_v32 }
 0x86e   :  { %v970_v5 = vpop.permute.xlu0 %969 }
 0x86f   :  { %972 = vst.msk [vmem:[#allocation5 + $0x28] sm:$0xff] %vm64_vm1, %v970_v5  ;;  %2541 = vmatmul.mubr.msk.f32.vlgmr.msra.gmra.mrb[10].mxu1 %vm64_vm1, %v970_v5 }
 0x870   :  { %2706 = vmatpush3.bf16.msra.mxu1 %v2996_v24  ;;  %2562 = vmatprep.mubr.msk.f32.mxu1 %vm2886_vm0, %v2884_v7 }
 0x871   :  { %2707 = vmatprep.subr.bf16.mxu1 %v2885_v8 }
 0x872   :  { %v923_v33 = vpop.permute.xlu0 %922 }
 0x873   :  { %v925_v35 = vmul.f32 %v923_v33, %v916_v17 }
 0x874   :  { %2709 = vmatpush3.bf16.msra.mxu1 %v3014_v28 }
 0x875   :  { %v3256_v63 = vadd.f32 %v925_v35, %v3200_v3  ;;  %2716 = vmatprep.subr.bf16.mxu1 %v2885_v8 }
 0x876   :  { %v244_v3 = vpop.permute.xlu0 %243 }
 0x877   :  { %964 = vrot.lane.b32.xlu1 %v3256_v63, %s2887_s8 }
 0x87b   :  { %245 = vrot.lane.b32.xlu1 %v3092_v1, %s2889_s0 }
 0x8e9   :  { %v965_v36 = vpop.permute.xlu1 %964 }
 0x8ea   :  { %967 = vst.msk [vmem:[#allocation4 + $0x10] sm:$0xff] %vm64_vm1, %v965_v36  ;;  %2530 = vmatmul.mubr.msk.f32.vlgmr.msra.gmra.mrb[18].mxu0 %vm64_vm1, %v965_v36 }
 0x8eb   :  { %2700 = vmatpush3.bf16.msra.mxu0 %v2966_v16  ;;  %2551 = vmatprep.mubr.msk.f32.mxu0 %vm2886_vm0, %v2884_v7 }
 0x8ec   :  { %2701 = vmatprep.subr.bf16.mxu0 %v2885_v8 }
 0x8ed   :  { %v246_v37 = vpop.permute.xlu1 %245 }
 0x8ee   :  { %v263_v38 = vsel %vm64_vm1, %v244_v3, %v246_v37 }
 0x8ef   :  { %279 = vst.msk [vmem:[#allocation3 + $0x20] sm:$0xff] %vm202_vm2, %v263_v38  ;;  %2703 = vmatpush3.bf16.msra.mxu0 %v2975_v19 }
 0x8f0   :  { %2710 = vmatprep.subr.bf16.mxu0 %v2885_v8 }
 0x8f6   :  { %v976_v42 = vld [vmem:[#allocation3 + $0x20] sm:$0xff] }
 0x942   :  { %v1117_v1 = vpop.f32.mrb[10].mxu1 }
 0x943   :  { %v1164_v39 = vadd.f32 %v1117_v1, %v3110_v14  ;;  %v2542_v40 = vpop.f32.mrb[11].mxu1  ;;  %v1157_v44 = vadd.f32 %v1117_v1, %v976_v42 }
 0x945   :  { %1166 = vrot.lane.b32.xlu0 %v1164_v39, %s2890_s27  ;;  %v2351_v46 = vmul.f32 -1.442695, %v1157_v44 }
 0x947   :  { %2798 = vpow2.f32 %v2351_v46 }
 0x949   :  { %1183 = vrot.lane.b32.xlu0 %v3241_v26, %s2889_s0 }
 0x94d   :  { %1179 = vperm.xlu0 %2761, %v3280_v41  }
 0x951   :  { %v2799_v47 = vpop.eup %2798 }
 0x952   :  { %v1161_v48 = vadd.f32 1.0, %v2799_v47 }
 0x954   :  { %2800 = vrcp.f32 %v1161_v48 }
 0x95e   :  { %v2801_v50 = vpop.eup %2800 }
 0x95f   :  { %v1176_v5 = vsub.f32 1.0, %v2801_v50 }
 0x9b7   :  { %v1167_v52 = vpop.permute.xlu0 %1166 }
 0x9b8   :  { %v1169_v54 = vmul.f32 %v2801_v50, %v1167_v52 }
 0x9ba   :  { %1171 = vrot.lane.b32.xlu1 %v1169_v54, %s2890_s27 }
 0x9bb   :  { %v1184_v15 = vpop.permute.xlu0 %1183 }
 0x9bd   :  { %v1045_v56 = vpop.f32.mrb[18].mxu0 }
 0x9be   :  { %v1128_v57 = vadd.f32 %v2990_v23, %v1045_v56  ;;  %v2531_v60 = vpop.f32.mrb[19].mxu0  ;;  %v1121_v0 = vadd.f32 %v1045_v56, %v975_v62 }
 0x9c0   :  { %1130 = vrot.lane.b32.xlu1 %v1128_v57, %s2890_s27  ;;  %v2350_v4 = vmul.f32 -1.442695, %v1121_v0 }
 0x9c2   :  { %2802 = vpow2.f32 %v2350_v4 }
 0x9cc   :  { %v2803_v6 = vpop.eup %2802  ;;  %v1180_v2 = vpop.permute.xlu0 %1179 }
 0x9cd   :  { %v1125_v10 = vadd.f32 1.0, %v2803_v6  ;;  %v1182_v32 = vmul.f32 %v1180_v2, %v1176_v5 }
 0x9cf   :  { %2804 = vrcp.f32 %v1125_v10 }
 0x9d9   :  { %v2805_v18 = vpop.eup %2804 }
 0x9da   :  { %v1140_v39 = vsub.f32 1.0, %v2805_v18 }
 0xa2c   :  { %v1172_v13 = vpop.permute.xlu1 %1171 }
 0xa2d   :  { %v1174_v11 = vadd.f32 %v1172_v13, %v976_v42 }
 0xa2f   :  { %2806 = vtanh.f32 %v1174_v11  ;;  %v1205_v11 = vld [vmem:[#allocation2 + $0x20] sm:$0xff] }
 0xa32   :  { %v1131_v20 = vpop.permute.xlu1 %1130 }
 0xa33   :  { %v1133_v21 = vmul.f32 %v2805_v18, %v1131_v20 }
 0xa35   :  { %1135 = vrot.lane.b32.xlu0 %v1133_v21, %s2890_s27 }
 0xa39   :  { %v2807_v22 = vpop.eup %2806 }
 0xa3a   :  { %v1186_v25 = vsub.f32 %v2807_v22, %v1184_v15 }
 0xa3c   :  { %1188 = vrot.lane.b32.xlu1 %v1186_v25, %s2887_s8 }
 0xa40   :  { %1147 = vrot.lane.b32.xlu1 %v3256_v63, %s2889_s0 }
 0xa44   :  { %1143 = vperm.xlu1 %2760, %v3293_v27  }
 0xaa7   :  { %v1136_v30 = vpop.permute.xlu0 %1135 }
 0xaa8   :  { %v1138_v31 = vadd.f32 %v1136_v30, %v975_v62 }
 0xaaa   :  { %2808 = vtanh.f32 %v1138_v31 }
 0xaae   :  { %v1189_v17 = vpop.permute.xlu1 %1188 }
 0xaaf   :  { %v1191_v33 = vmul.f32 %v1189_v17, %v1182_v32 }
 0xab1   :  { %v3297_v35 = vadd.f32 %v1191_v33, %v3241_v26 }
 0xab2   :  { %v1148_v3 = vpop.permute.xlu1 %1147 }
 0xab3   :  { %1199 = vrot.lane.b32.xlu0 %v3297_v35, %s2887_s8 }
 0xab4   :  { %v2809_v36 = vpop.eup %2808 }
 0xab5   :  { %v1150_v37 = vsub.f32 %v2809_v36, %v1148_v3 }
 0xab7   :  { %1152 = vrot.lane.b32.xlu0 %v1150_v37, %s2887_s8 }
 0xabb   :  { %239 = vrot.lane.b32.xlu0 %v3084_v59, %s2889_s0 }
 0xac3   :  { %v1144_v38 = vpop.permute.xlu1 %1143 }
 0xac4   :  { %v1146_v26 = vmul.f32 %v1144_v38, %v1140_v39 }
 0xb25   :  { %v1200_v1 = vpop.permute.xlu0 %1199 }
 0xb26   :  { %1202 = vst.msk [vmem:[#allocation5 + $0x20] sm:$0xff] %vm64_vm1, %v1200_v1  ;;  %2563 = vmatmul.mubr.msk.f32.vlgmr.msra.gmra.mrb[12].mxu1 %vm64_vm1, %v1200_v1 }
 0xb27   :  { %2718 = vmatpush3.bf16.msra.mxu1 %v2996_v24  ;;  %2584 = vmatprep.mubr.msk.f32.mxu1 %vm2886_vm0, %v2884_v7 }
 0xb28   :  { %2719 = vmatprep.subr.bf16.mxu1 %v2885_v8 }
 0xb29   :  { %v1153_v40 = vpop.permute.xlu0 %1152 }
 0xb2a   :  { %v1155_v42 = vmul.f32 %v1153_v40, %v1146_v26 }
 0xb2b   :  { %2721 = vmatpush3.bf16.msra.mxu1 %v3014_v28 }
 0xb2c   :  { %v3312_v59 = vadd.f32 %v1155_v42, %v3256_v63  ;;  %2728 = vmatprep.subr.bf16.mxu1 %v2885_v8 }
 0xb2d   :  { %v240_v63 = vpop.permute.xlu0 %239 }
 0xb2e   :  { %1194 = vrot.lane.b32.xlu1 %v3312_v59, %s2887_s8 }
 0xb32   :  { %241 = vrot.lane.b32.xlu1 %v3086_v61, %s2889_s0 }
 0xba0   :  { %v1195_v44 = vpop.permute.xlu1 %1194 }
 0xba1   :  { %1197 = vst.msk [vmem:[#allocation4 + $0x18] sm:$0xff] %vm64_vm1, %v1195_v44  ;;  %2552 = vmatmul.mubr.msk.f32.vlgmr.msra.gmra.mrb[20].mxu0 %vm64_vm1, %v1195_v44 }
 0xba2   :  { %2712 = vmatpush3.bf16.msra.mxu0 %v2966_v16  ;;  %2573 = vmatprep.mubr.msk.f32.mxu0 %vm2886_vm0, %v2884_v7 }
 0xba3   :  { %2713 = vmatprep.subr.bf16.mxu0 %v2885_v8 }
 0xba4   :  { %v242_v46 = vpop.permute.xlu1 %241 }
 0xba5   :  { %v262_v47 = vsel %vm64_vm1, %v240_v63, %v242_v46 }
 0xba6   :  { %278 = vst.msk [vmem:[#allocation3 + $0x18] sm:$0xff] %vm202_vm2, %v262_v47  ;;  %2715 = vmatpush3.bf16.msra.mxu0 %v2975_v19 }
 0xba7   :  { %2722 = vmatprep.subr.bf16.mxu0 %v2885_v8 }
 0xbad   :  { %v1206_v52 = vld [vmem:[#allocation3 + $0x18] sm:$0xff] }
 0xbf9   :  { %v1347_v61 = vpop.f32.mrb[12].mxu1 }
 0xbfa   :  { %v1394_v48 = vadd.f32 %v1347_v61, %v3110_v14  ;;  %v2564_v50 = vpop.f32.mrb[13].mxu1  ;;  %v1387_v54 = vadd.f32 %v1347_v61, %v1206_v52 }
 0xbfc   :  { %1396 = vrot.lane.b32.xlu0 %v1394_v48, %s2890_s27  ;;  %v2355_v56 = vmul.f32 -1.442695, %v1387_v54 }
 0xbfe   :  { %2810 = vpow2.f32 %v2355_v56 }
 0xc00   :  { %1413 = vrot.lane.b32.xlu0 %v3297_v35, %s2889_s0 }
 0xc04   :  { %1409 = vperm.xlu0 %2761, %v3293_v27   ;;  %v1431_v27 = vsel %vm1430_vm7, 1, %v2888_v12 }
 0xc08   :  { %v2811_v57 = vpop.eup %2810 }
 0xc09   :  { %v1391_v60 = vadd.f32 1.0, %v2811_v57 }
 0xc0b   :  { %2812 = vrcp.f32 %v1391_v60 }
 0xc15   :  { %v2813_v62 = vpop.eup %2812 }
 0xc16   :  { %v1406_v3 = vsub.f32 1.0, %v2813_v62 }
 0xc6e   :  { %v1397_v0 = vpop.permute.xlu0 %1396 }
 0xc6f   :  { %v1399_v4 = vmul.f32 %v2813_v62, %v1397_v0 }
 0xc71   :  { %1401 = vrot.lane.b32.xlu1 %v1399_v4, %s2890_s27 }
 0xc74   :  { %v1275_v6 = vpop.f32.mrb[20].mxu0 }
 0xc75   :  { %v1358_v10 = vadd.f32 %v2990_v23, %v1275_v6  ;;  %v2553_v13 = vpop.f32.mrb[21].mxu0  ;;  %v1351_v18 = vadd.f32 %v1275_v6, %v1205_v11  ;;  %v1414_v23 = vpop.permute.xlu0 %1413 }
 0xc77   :  { %1360 = vrot.lane.b32.xlu1 %v1358_v10, %s2890_s27  ;;  %v2354_v20 = vmul.f32 -1.442695, %v1351_v18  ;;  %v3385_v18 = vld [vmem:[%s3554_s5 + $0x1] ss:$0 sm:$0xff] }
 0xc79   :  { %2814 = vpow2.f32 %v2354_v20 }
 0xc83   :  { %v2815_v21 = vpop.eup %2814  ;;  %v1410_v17 = vpop.permute.xlu0 %1409 }
 0xc84   :  { %v1355_v22 = vadd.f32 1.0, %v2815_v21  ;;  %v1412_v37 = vmul.f32 %v1410_v17, %v1406_v3 }
 0xc86   :  { %2816 = vrcp.f32 %v1355_v22  ;;  %v1458_v22 = vld [vmem:[#allocation2 + $0x28] sm:$0xff] }
 0xc90   :  { %v2817_v2 = vpop.eup %2816 }
 0xc91   :  { %v1370_v46 = vsub.f32 1.0, %v2817_v2 }
 0xce3   :  { %v1402_v15 = vpop.permute.xlu1 %1401 }
 0xce4   :  { %v1404_v25 = vadd.f32 %v1402_v15, %v1206_v52 }
 0xce6   :  { %2818 = vtanh.f32 %v1404_v25 }
 0xce9   :  { %v1361_v30 = vpop.permute.xlu1 %1360 }
 0xcea   :  { %v1363_v31 = vmul.f32 %v2817_v2, %v1361_v30 }
 0xcec   :  { %1365 = vrot.lane.b32.xlu0 %v1363_v31, %s2890_s27 }
 0xcf0   :  { %v2819_v5 = vpop.eup %2818 }
 0xcf1   :  { %v1416_v32 = vsub.f32 %v2819_v5, %v1414_v23 }
 0xcf3   :  { %1418 = vrot.lane.b32.xlu1 %v1416_v32, %s2887_s8 }
 0xcf7   :  { %1377 = vrot.lane.b32.xlu1 %v3312_v59, %s2889_s0 }
 0xcfb   :  { %1373 = vperm.xlu1 %2760, %v3280_v41  }
 0xd5e   :  { %v1366_v33 = vpop.permute.xlu0 %1365 }
 0xd5f   :  { %v1368_v36 = vadd.f32 %v1366_v33, %v1205_v11 }
 0xd61   :  { %2820 = vtanh.f32 %v1368_v36 }
 0xd65   :  { %v1419_v38 = vpop.permute.xlu1 %1418 }
 0xd66   :  { %v1421_v1 = vmul.f32 %v1419_v38, %v1412_v37 }
 0xd68   :  { %v3343_v39 = vadd.f32 %v1421_v1, %v3297_v35 }
 0xd69   :  { %v1378_v40 = vpop.permute.xlu1 %1377 }
 0xd6a   :  { %1439 = vrot.lane.b32.xlu0 %v3343_v39, %s2887_s8 }
 0xd6b   :  { %v2821_v26 = vpop.eup %2820 }
 0xd6c   :  { %v1380_v42 = vsub.f32 %v2821_v26, %v1378_v40 }
 0xd6e   :  { %1382 = vrot.lane.b32.xlu0 %v1380_v42, %s2887_s8 }
 0xd72   :  { %235 = vrot.lane.b32.xlu0 %v3078_v53, %s2889_s0 }
 0xd7a   :  { %v1374_v44 = vpop.permute.xlu1 %1373 }
 0xd7b   :  { %v1376_v35 = vmul.f32 %v1374_v44, %v1370_v46 }
 0xddc   :  { %v3350_v63 = vpop.permute.xlu0 %1439 }
 0xddd   :  { %2585 = vmatmul.mubr.msk.f32.vlgmr.msra.gmra.mrb[14].mxu1 %vm64_vm1, %v3350_v63 }
 0xdde   :  { %2730 = vmatpush3.bf16.msra.mxu1 %v2996_v24  ;;  %2606 = vmatprep.mubr.msk.f32.mxu1 %vm2886_vm0, %v2884_v7 }
 0xddf   :  { %2731 = vmatprep.subr.bf16.mxu1 %v2885_v8 }
 0xde0   :  { %v1383_v47 = vpop.permute.xlu0 %1382 }
 0xde1   :  { %v1385_v61 = vmul.f32 %v1383_v47, %v1376_v35 }
 0xde2   :  { %2733 = vmatpush3.bf16.msra.mxu1 %v3014_v28 }
 0xde3   :  { %v3360_v53 = vadd.f32 %v1385_v61, %v3312_v59  ;;  %2740 = vmatprep.subr.bf16.mxu1 %v2885_v8 }
 0xde4   :  { %v236_v59 = vpop.permute.xlu0 %235 }
 0xde5   :  { %1461 = vrot.lane.b32.xlu1 %v3360_v53, %s2887_s8 }
 0xde9   :  { %237 = vrot.lane.b32.xlu1 %v3080_v55, %s2889_s0 }
 0xe57   :  { %v1462_v48 = vpop.permute.xlu1 %1461 }
 0xe58   :  { %2574 = vmatmul.mubr.msk.f32.vlgmr.msra.gmra.mrb[22].mxu0 %vm64_vm1, %v1462_v48 }
 0xe59   :  { %2724 = vmatpush3.bf16.msra.mxu0 %v2966_v16  ;;  %2595 = vmatprep.mubr.msk.f32.mxu0 %vm2886_vm0, %v2884_v7 }
 0xe5a   :  { %2725 = vmatprep.subr.bf16.mxu0 %v2885_v8 }
 0xe5b   :  { %v238_v50 = vpop.permute.xlu1 %237 }
 0xe5c   :  { %v261_v52 = vsel %vm64_vm1, %v236_v59, %v238_v50 }
 0xe5d   :  { %277 = vst.msk [vmem:[#allocation3 + $0x10] sm:$0xff] %vm202_vm2, %v261_v52  ;;  %2727 = vmatpush3.bf16.msra.mxu0 %v2975_v19 }
 0xe5e   :  { %2734 = vmatprep.subr.bf16.mxu0 %v2885_v8 }
 0xe64   :  { %v1459_v57 = vld [vmem:[#allocation3 + $0x10] sm:$0xff] }
 0xeb0   :  { %v1603_v55 = vpop.f32.mrb[14].mxu1 }
 0xeb1   :  { %v1650_v54 = vadd.f32 %v1603_v55, %v3110_v14  ;;  %v2586_v56 = vpop.f32.mrb[15].mxu1  ;;  %v1643_v60 = vadd.f32 %v1603_v55, %v1459_v57 }
 0xeb3   :  { %1652 = vrot.lane.b32.xlu0 %v1650_v54, %s2890_s27  ;;  %v2359_v62 = vmul.f32 -1.442695, %v1643_v60 }
 0xeb5   :  { %2822 = vpow2.f32 %v2359_v62 }
 0xeb7   :  { %1669 = vrot.lane.b32.xlu0 %v3343_v39, %s2889_s0 }
 0xebb   :  { %1665 = vperm.xlu0 %2761, %v3237_v9   ;;  %v1959_v9 = vsel %vm1958_vm5, 1, %v2888_v12 }
 0xebf   :  { %v2823_v0 = vpop.eup %2822 }
 0xec0   :  { %v1647_v4 = vadd.f32 1.0, %v2823_v0 }
 0xec2   :  { %2824 = vrcp.f32 %v1647_v4 }
 0xecc   :  { %v2825_v6 = vpop.eup %2824 }
 0xecd   :  { %v1662_v26 = vsub.f32 1.0, %v2825_v6 }
 0xf25   :  { %v1653_v10 = vpop.permute.xlu0 %1652 }
 0xf26   :  { %v1655_v13 = vmul.f32 %v2825_v6, %v1653_v10 }
 0xf28   :  { %1657 = vrot.lane.b32.xlu1 %v1655_v13, %s2890_s27 }
 0xf29   :  { %v1670_v36 = vpop.permute.xlu0 %1669 }
 0xf2b   :  { %v1531_v11 = vpop.f32.mrb[22].mxu0 }
 0xf2c   :  { %v1614_v20 = vadd.f32 %v3385_v18, %v1531_v11  ;;  %v2575_v21 = vpop.f32.mrb[23].mxu0  ;;  %v1607_v15 = vadd.f32 %v1531_v11, %v1458_v22 }
 0xf2e   :  { %1616 = vrot.lane.b32.xlu1 %v1614_v20, %s2890_s27  ;;  %v2358_v25 = vmul.f32 -1.442695, %v1607_v15 }
 0xf30   :  { %2826 = vpow2.f32 %v2358_v25 }
 0xf3a   :  { %v2827_v2 = vpop.eup %2826  ;;  %v1666_v37 = vpop.permute.xlu0 %1665 }
 0xf3b   :  { %v1611_v30 = vadd.f32 1.0, %v2827_v2  ;;  %v1668_v40 = vmul.f32 %v1666_v37, %v1662_v26 }
 0xf3d   :  { %2828 = vrcp.f32 %v1611_v30 }
 0xf47   :  { %v2829_v23 = vpop.eup %2828 }
 0xf48   :  { %v1626_v50 = vsub.f32 1.0, %v2829_v23 }
 0xf9a   :  { %v1658_v31 = vpop.permute.xlu1 %1657 }
 0xf9b   :  { %v1660_v5 = vadd.f32 %v1658_v31, %v1459_v57 }
 0xf9d   :  { %2830 = vtanh.f32 %v1660_v5 }
 0xfa0   :  { %v1617_v32 = vpop.permute.xlu1 %1616 }
 0xfa1   :  { %v1619_v17 = vmul.f32 %v2829_v23, %v1617_v32 }
 0xfa3   :  { %1621 = vrot.lane.b32.xlu0 %v1619_v17, %s2890_s27 }
 0xfa7   :  { %v2831_v33 = vpop.eup %2830 }
 0xfa8   :  { %v1672_v3 = vsub.f32 %v2831_v33, %v1670_v36 }
 0xfaa   :  { %1674 = vrot.lane.b32.xlu1 %v1672_v3, %s2887_s8 }
 0xfae   :  { %1633 = vrot.lane.b32.xlu1 %v3360_v53, %s2889_s0 }
 0xfb2   :  { %1629 = vperm.xlu1 %2760, %v3224_v34   ;;  %v1970_v34 = vld [vmem:[%s3550_s1 + $0x38] sm:$0xff] }
 0xfb3   :  { %vm2200_vm11 = vcmp.gt.f32.partialorder %v1970_v34, 0.0 }
0x1015   :  { %v1622_v38 = vpop.permute.xlu0 %1621 }
0x1016   :  { %v1624_v1 = vadd.f32 %v1622_v38, %v1458_v22  ;;  %v1715_v22 = vld [vmem:[#allocation2 + $0x30] sm:$0xff] }
0x1018   :  { %2832 = vtanh.f32 %v1624_v1 }
0x101c   :  { %v1675_v42 = vpop.permute.xlu1 %1674 }
0x101d   :  { %v1677_v44 = vmul.f32 %v1675_v42, %v1668_v40 }
0x101f   :  { %v3395_v46 = vadd.f32 %v1677_v44, %v3343_v39 }
0x1020   :  { %v1634_v47 = vpop.permute.xlu1 %1633 }
0x1021   :  { %1696 = vrot.lane.b32.xlu0 %v3395_v46, %s2887_s8 }
0x1022   :  { %v2833_v35 = vpop.eup %2832 }
0x1023   :  { %v1636_v61 = vsub.f32 %v2833_v35, %v1634_v47 }
0x1025   :  { %1638 = vrot.lane.b32.xlu0 %v1636_v61, %s2887_s8 }
0x1029   :  { %231 = vrot.lane.b32.xlu0 %v3072_v49, %s2889_s0 }
0x1031   :  { %v1630_v48 = vpop.permute.xlu1 %1629 }
0x1032   :  { %v1632_v39 = vmul.f32 %v1630_v48, %v1626_v50 }
0x1093   :  { %v3402_v59 = vpop.permute.xlu0 %1696 }
0x1094   :  { %2607 = vmatmul.mubr.msk.f32.vlgmr.msra.gmra.mrb[16].mxu1 %vm64_vm1, %v3402_v59 }
0x1095   :  { %2742 = vmatpush3.bf16.msra.mxu1 %v2996_v24  ;;  %2628 = vmatprep.mubr.msk.f32.mxu1 %vm2886_vm0, %v2884_v7 }
0x1096   :  { %2743 = vmatprep.subr.bf16.mxu1 %v2885_v8 }
0x1097   :  { %v1639_v52 = vpop.permute.xlu0 %1638 }
0x1098   :  { %v1641_v55 = vmul.f32 %v1639_v52, %v1632_v39 }
0x1099   :  { %2745 = vmatpush3.bf16.msra.mxu1 %v3014_v28 }
0x109a   :  { %v3412_v49 = vadd.f32 %v1641_v55, %v3360_v53 }
0x109b   :  { %v232_v28 = vpop.permute.xlu0 %231 }
0x109c   :  { %1718 = vrot.lane.b32.xlu1 %v3412_v49, %s2887_s8 }
0x10a0   :  { %233 = vrot.lane.b32.xlu1 %v3074_v51, %s2889_s0 }
0x110e   :  { %v1719_v24 = vpop.permute.xlu1 %1718 }
0x110f   :  { %2596 = vmatmul.mubr.msk.f32.vlgmr.msra.gmra.mrb[24].mxu0 %vm64_vm1, %v1719_v24 }
0x1110   :  { %2736 = vmatpush3.bf16.msra.mxu0 %v2966_v16  ;;  %2617 = vmatprep.mubr.msk.f32.mxu0 %vm2886_vm0, %v2884_v7 }
0x1111   :  { %2737 = vmatprep.subr.bf16.mxu0 %v2885_v8 }
0x1112   :  { %v234_v54 = vpop.permute.xlu1 %233 }
0x1113   :  { %v260_v56 = vsel %vm64_vm1, %v232_v28, %v234_v54 }
0x1114   :  { %276 = vst.msk [vmem:[#allocation3 + $0x8] sm:$0xff] %vm202_vm2, %v260_v56  ;;  %2739 = vmatpush3.bf16.msra.mxu0 %v2975_v19 }
0x1115   :  { %2746 = vmatprep.subr.bf16.mxu0 %v2885_v8 }
0x111b   :  { %v1716_v16 = vld [vmem:[#allocation3 + $0x8] sm:$0xff] }
0x1167   :  { %v1860_v51 = vpop.f32.mrb[16].mxu1 }
0x1168   :  { %v1907_v57 = vadd.f32 %v1860_v51, %v3110_v14  ;;  %v2608_v60 = vpop.f32.mrb[17].mxu1  ;;  %v1900_v62 = vadd.f32 %v1860_v51, %v1716_v16 }
0x116a   :  { %1909 = vrot.lane.b32.xlu0 %v1907_v57, %s2890_s27  ;;  %v2363_v0 = vmul.f32 -1.442695, %v1900_v62 }
0x116c   :  { %2834 = vpow2.f32 %v2363_v0 }
0x116e   :  { %1926 = vrot.lane.b32.xlu0 %v3395_v46, %s2889_s0 }
0x1172   :  { %1922 = vperm.xlu0 %2761, %v3181_v58  }
0x1176   :  { %v2835_v4 = vpop.eup %2834 }
0x1177   :  { %v1904_v6 = vadd.f32 1.0, %v2835_v4 }
0x1179   :  { %2836 = vrcp.f32 %v1904_v6 }
0x1183   :  { %v2837_v19 = vpop.eup %2836 }
0x1184   :  { %v1919_v26 = vsub.f32 1.0, %v2837_v19 }
0x11dc   :  { %v1910_v10 = vpop.permute.xlu0 %1909 }
0x11dd   :  { %v1912_v13 = vmul.f32 %v2837_v19, %v1910_v10 }
0x11df   :  { %1914 = vrot.lane.b32.xlu1 %v1912_v13, %s2890_s27 }
0x11e0   :  { %v1927_v36 = vpop.permute.xlu0 %1926 }
0x11e2   :  { %v1788_v11 = vpop.f32.mrb[24].mxu0 }
0x11e3   :  { %v1871_v20 = vadd.f32 %v3385_v18, %v1788_v11  ;;  %v2597_v21 = vpop.f32.mrb[25].mxu0  ;;  %v1864_v15 = vadd.f32 %v1788_v11, %v1715_v22 }
0x11e5   :  { %1873 = vrot.lane.b32.xlu1 %v1871_v20, %s2890_s27  ;;  %v2362_v25 = vmul.f32 -1.442695, %v1864_v15  ;;  %v1972_v20 = vld [vmem:[#allocation2 + $0x38] sm:$0xff] }
0x11e7   :  { %2838 = vpow2.f32 %v2362_v25 }
0x11f1   :  { %v2839_v2 = vpop.eup %2838  ;;  %v1923_v37 = vpop.permute.xlu0 %1922 }
0x11f2   :  { %v1868_v30 = vadd.f32 1.0, %v2839_v2  ;;  %v1925_v40 = vmul.f32 %v1923_v37, %v1919_v26  ;;  %v1687_v37 = vsel %vm1686_vm8, 1, %v2888_v12 }
0x11f4   :  { %2840 = vrcp.f32 %v1868_v30 }
0x11fe   :  { %v2841_v23 = vpop.eup %2840 }
0x11ff   :  { %v1883_v39 = vsub.f32 1.0, %v2841_v23 }
0x1251   :  { %v1915_v31 = vpop.permute.xlu1 %1914 }
0x1252   :  { %v1917_v5 = vadd.f32 %v1915_v31, %v1716_v16 }
0x1254   :  { %2842 = vtanh.f32 %v1917_v5 }
0x1257   :  { %v1874_v32 = vpop.permute.xlu1 %1873 }
0x1258   :  { %v1876_v17 = vmul.f32 %v2841_v23, %v1874_v32  ;;  %v1702_v23 = vsel %vm1701_vm3, 1, %v2888_v12 }
0x125a   :  { %1878 = vrot.lane.b32.xlu0 %v1876_v17, %s2890_s27 }
0x125e   :  { %v2843_v33 = vpop.eup %2842 }
0x125f   :  { %v1929_v3 = vsub.f32 %v2843_v33, %v1927_v36  ;;  %v1445_v36 = vsel %vm1444_vm4, 1, %v2888_v12  ;;  %vm2313_vm4 = vcmask 64512  }
0x1261   :  { %1931 = vrot.lane.b32.xlu1 %v1929_v3, %s2887_s8 }
0x1265   :  { %1890 = vrot.lane.b32.xlu1 %v3412_v49, %s2889_s0 }
0x1269   :  { %1886 = vperm.xlu1 %2760, %v3168_v29  }
0x12cc   :  { %v1879_v38 = vpop.permute.xlu0 %1878 }
0x12cd   :  { %v1881_v1 = vadd.f32 %v1879_v38, %v1715_v22  ;;  %v1679_v38 = vld [vmem:[#allocation5 + $0x28] sm:$0xff] }
0x12cf   :  { %2844 = vtanh.f32 %v1881_v1 }
0x12d3   :  { %v1932_v42 = vpop.permute.xlu1 %1931 }
0x12d4   :  { %v1934_v44 = vmul.f32 %v1932_v42, %v1925_v40 }
0x12d6   :  { %v3441_v35 = vadd.f32 %v1934_v44, %v3395_v46 }
0x12d7   :  { %v1891_v61 = vpop.permute.xlu1 %1890 }
0x12d8   :  { %1953 = vrot.lane.b32.xlu0 %v3441_v35, %s2887_s8 }
0x12d9   :  { %v2845_v47 = vpop.eup %2844 }
0x12da   :  { %v1893_v48 = vsub.f32 %v2845_v47, %v1891_v61  ;;  %v2859_v61 = vld [vmem:[%s3550_s1 + $0x30] sm:$0xff] }
0x12db   :  { %vm1943_vm9 = vcmp.gt.f32.partialorder %v2859_v61, 0.0 }
0x12dc   :  { %1895 = vrot.lane.b32.xlu0 %v1893_v48, %s2887_s8  ;;  %v1437_v48 = vld [vmem:[#allocation4 + $0x18] sm:$0xff] }
0x12e0   :  { %227 = vrot.lane.b32.xlu0 %v3066_v43, %s2889_s0 }
0x12e8   :  { %v1887_v29 = vpop.permute.xlu1 %1886 }
0x12e9   :  { %v1889_v46 = vmul.f32 %v1887_v29, %v1883_v39  ;;  %v1423_v29 = vld [vmem:[#allocation5 + $0x20] sm:$0xff]  ;;  %v1442_v39 = vadd.f32 %v3350_v63, %v1437_v48 }
0x134a   :  { %v3448_v50 = vpop.permute.xlu0 %1953 }
0x134b   :  { %2629 = vmatmul.mubr.msk.f32.vlgmr.msra.gmra.mrb[18].mxu1 %vm64_vm1, %v3448_v50 }
0x134e   :  { %v1896_v52 = vpop.permute.xlu0 %1895 }
0x134f   :  { %v1898_v55 = vmul.f32 %v1896_v52, %v1889_v46  ;;  %v1944_v46 = vsel %vm1943_vm9, 1, %v2888_v12  ;;  %v1443_v52 = vmul.f32 0.5, %v1442_v39 }
0x1351   :  { %v3453_v24 = vadd.f32 %v1898_v55, %v3412_v49 }
0x1352   :  { %v228_v28 = vpop.permute.xlu0 %227 }
0x1353   :  { %1975 = vrot.lane.b32.xlu1 %v3453_v24, %s2887_s8 }
0x1357   :  { %229 = vrot.lane.b32.xlu1 %v3068_v45, %s2889_s0  ;;  %v1971_v45 = vld [vmem:[%s3550_s1] sm:$0xff] }
0x1358   :  { %vm2215_vm6 = vcmp.gt.f32.partialorder %v1971_v45, 0.0 }
0x1359   :  { %v2216_v3 = vsel %vm2215_vm6, 1, %v2888_v12 }
0x13c5   :  { %v1976_v43 = vpop.permute.xlu1 %1975 }
0x13c6   :  { %2618 = vmatmul.mubr.msk.f32.vlgmr.msra.gmra.mrb[26].mxu0 %vm64_vm1, %v1976_v43 }
0x13c7   :  { %2639 = vmatprep.mubr.msk.f32.mxu0 %vm2886_vm0, %v2884_v7 }
0x13c9   :  { %v230_v54 = vpop.permute.xlu1 %229 }
0x13ca   :  { %v259_v56 = vsel %vm64_vm1, %v228_v28, %v230_v54  ;;  %v1694_v54 = vld [vmem:[#allocation4 + $0x10] sm:$0xff] }
0x13cb   :  { %275 = vst.msk [vmem:[#allocation3] sm:$0xff] %vm202_vm2, %v259_v56  ;;  %v1936_v56 = vld [vmem:[#allocation5 + $0x30] sm:$0xff] }
0x13d2   :  { %v1973_v7 = vld [vmem:[#allocation3] sm:$0xff] }
0x141e   :  { %v2117_v51 = vpop.f32.mrb[18].mxu1 }
0x141f   :  { %v2164_v57 = vadd.f32 %v2117_v51, %v3110_v14  ;;  %v2630_v60 = vpop.f32.mrb[19].mxu1  ;;  %v2157_v16 = vadd.f32 %v2117_v51, %v1973_v7 }
0x1420   :  { %v2201_v60 = vsel %vm2200_vm11, 1, %v2888_v12  ;;  %v2227_v12 = vld [vmem:[%s3555_s6] sm:$0xff] }
0x1421   :  { %2166 = vrot.lane.b32.xlu0 %v2164_v57, %s2890_s27  ;;  %v2367_v62 = vmul.f32 -1.442695, %v2157_v16  ;;  %v1699_v57 = vadd.f32 %v3402_v59, %v1694_v54 }
0x1423   :  { %2846 = vpow2.f32 %v2367_v62 }
0x1425   :  { %2183 = vrot.lane.b32.xlu0 %v3441_v35, %s2889_s0 }
0x1429   :  { %2179 = vperm.xlu0 %2761, %v1971_v45   ;;  %v1951_v45 = vld [vmem:[#allocation4 + $0x8] sm:$0xff] }
0x142a   :  { %v1956_v16 = vadd.f32 %v3448_v50, %v1951_v45  ;;  %v2228_v50 = vld [vmem:[%s3555_s6 + $0x8] sm:$0xff] }
0x142c   :  { %v1957_v59 = vmul.f32 0.5, %v1956_v16 }
0x142d   :  { %v2847_v0 = vpop.eup %2846 }
0x142e   :  { %v2161_v4 = vadd.f32 1.0, %v2847_v0 }
0x1430   :  { %2848 = vrcp.f32 %v2161_v4  ;;  %v2193_v4 = vld [vmem:[#allocation5 + $0x38] sm:$0xff] }
0x143a   :  { %v2849_v6 = vpop.eup %2848 }
0x143b   :  { %v2176_v1 = vsub.f32 1.0, %v2849_v6 }
0x1493   :  { %v2167_v14 = vpop.permute.xlu0 %2166 }
0x1494   :  { %v2169_v19 = vmul.f32 %v2849_v6, %v2167_v14  ;;  %v2229_v14 = vld [vmem:[%s3555_s6 + $0x10] sm:$0xff] }
0x1496   :  { %2171 = vrot.lane.b32.xlu1 %v2169_v19, %s2890_s27  ;;  %v2747_v19 = vpack.c.bf16 %v2228_v50, %v2227_v12 }
0x1497   :  { %v2184_v17 = vpop.permute.xlu0 %2183 }
0x1498   :  { %2748 = vmatpush3.bf16.msra.mxu0 %v2747_v19 }
0x1499   :  { %v2045_v10 = vpop.f32.mrb[26].mxu0  ;;  %2749 = vmatprep.subr.bf16.mxu0 %v2885_v8 }
0x149a   :  { %v2128_v13 = vadd.f32 %v3385_v18, %v2045_v10  ;;  %v2619_v11 = vpop.f32.mrb[27].mxu0  ;;  %v2121_v21 = vadd.f32 %v2045_v10, %v1972_v20  ;;  %v2230_v10 = vld [vmem:[%s3555_s6 + $0x18] sm:$0xff] }
0x149b   :  { %v2208_v11 = vld [vmem:[#allocation4] sm:$0xff] }
0x149c   :  { %2130 = vrot.lane.b32.xlu1 %v2128_v13, %s2890_s27  ;;  %v2366_v22 = vmul.f32 -1.442695, %v2121_v21  ;;  %v2750_v13 = vpack.c.bf16 %v2230_v10, %v2229_v14 }
0x149e   :  { %2850 = vpow2.f32 %v2366_v22  ;;  %2751 = vmatpush3.bf16.msra.mxu0 %v2750_v13 }
0x14a8   :  { %v2851_v15 = vpop.eup %2850  ;;  %v2180_v58 = vpop.permute.xlu0 %2179 }
0x14a9   :  { %v2125_v25 = vadd.f32 1.0, %v2851_v15  ;;  %v2182_v26 = vmul.f32 %v2180_v58, %v2176_v1 }
0x14ab   :  { %2852 = vrcp.f32 %v2125_v25 }
0x14b5   :  { %v3474_v31 = vpop.eup %2852 }
0x1508   :  { %v2172_v2 = vpop.permute.xlu1 %2171 }
0x1509   :  { %v2174_v30 = vadd.f32 %v2172_v2, %v1973_v7  ;;  %v1700_v7 = vmul.f32 0.5, %v1699_v57 }
0x150b   :  { %2854 = vtanh.f32 %v2174_v30 }
0x150e   :  { %v2131_v5 = vpop.permute.xlu1 %2130 }
0x150f   :  { %v2133_v18 = vmul.f32 %v3474_v31, %v2131_v5 }
0x1511   :  { %2135 = vrot.lane.b32.xlu0 %v2133_v18, %s2890_s27 }
0x1515   :  { %v2855_v32 = vpop.eup %2854  ;;  %1704 = vperm.xlu0 %2761, %v1702_v23  }
0x1516   :  { %v2186_v33 = vsub.f32 %v2855_v32, %v2184_v17 }
0x1518   :  { %2188 = vrot.lane.b32.xlu1 %v2186_v33, %s2887_s8 }
0x1519   :  { %2147 = vrot.lane.b32.xlu0 %v3453_v24, %s2889_s0 }
0x151c   :  { %1447 = vperm.xlu1 %2760, %v1445_v36   ;;  %v2140_v36 = vsub.f32 1.0, %v3474_v31 }
0x1520   :  { %1961 = vperm.xlu1 %2760, %v1959_v9  }
0x1524   :  { %2218 = vperm.xlu1 %2760, %v2216_v3  }
0x1528   :  { %1433 = vperm.xlu1 %2760, %v1431_v27  }
0x152c   :  { %1689 = vperm.xlu1 %2760, %v1687_v37  }
0x1530   :  { %1681 = vrot.lane.b32.xlu1 %v1679_v38, %s2889_s0 }
0x1583   :  { %v2136_v41 = vpop.permute.xlu0 %2135 }
0x1584   :  { %v2138_v47 = vadd.f32 %v2136_v41, %v1972_v20 }
0x1586   :  { %2856 = vtanh.f32 %v2138_v47 }
0x158a   :  { %v2189_v40 = vpop.permute.xlu1 %2188 }
0x158b   :  { %v2191_v42 = vmul.f32 %v2189_v40, %v2182_v26 }
0x158d   :  { %v2192_v44 = vadd.f32 %v2191_v42, %v3441_v35 }
0x158f   :  { %2210 = vrot.lane.b32.xlu0 %v2192_v44, %s2887_s8 }
0x1590   :  { %v2857_v51 = vpop.eup %2856 }
0x1593   :  { %2143 = vperm.xlu0 %2761, %v1970_v34  }
0x1594   :  { %v1705_v35 = vpop.permute.xlu0 %1704 }
0x1595   :  { %vm1706_vm12 = vcmp.eq.s32.totalorder %v1705_v35, 1 }
0x1596   :  { %v1707_v0 = vsel %vm1706_vm12, %v1700_v7, -inf }
0x1597   :  { %1425 = vrot.lane.b32.xlu0 %v1423_v29, %s2889_s0 }
0x1598   :  { %v2148_v43 = vpop.permute.xlu0 %2147 }
0x1599   :  { %v2150_v63 = vsub.f32 %v2857_v51, %v2148_v43 }
0x159b   :  { %1946 = vperm.xlu0 %2761, %v1944_v46   ;;  %v1448_v55 = vpop.permute.xlu1 %1447 }
0x159c   :  { %vm1449_vm10 = vcmp.eq.s32.totalorder %v1448_v55, 1 }
0x159d   :  { %v1450_v28 = vsel %vm1449_vm10, %v1443_v52, -inf }
0x159e   :  { %1452 = vrot.lane.b32.xlu1 %v1450_v28, %s2889_s0 }
0x159f   :  { %1938 = vrot.lane.b32.xlu0 %v1936_v56, %s2889_s0  ;;  %v1962_v62 = vpop.permute.xlu1 %1961 }
0x15a0   :  { %vm1963_vm13 = vcmp.eq.s32.totalorder %v1962_v62, 1 }
0x15a1   :  { %v1964_v6 = vsel %vm1963_vm13, %v1957_v59, -inf }
0x15a2   :  { %2152 = vrot.lane.b32.xlu1 %v2150_v63, %s2887_s8 }
0x15a3   :  { %2203 = vperm.xlu0 %2761, %v2201_v60   ;;  %v2219_v21 = vpop.permute.xlu1 %2218 }
0x15a4   :  { %vm2220_vm14 = vcmp.eq.s32.totalorder %v2219_v21, 1 }
0x15a6   :  { %1709 = vrot.lane.b32.xlu1 %v1707_v0, %s2889_s0 }
0x15a7   :  { %2195 = vrot.lane.b32.xlu0 %v2193_v4, %s2889_s0  ;;  %v1434_v30 = vpop.permute.xlu1 %1433 }
0x15a8   :  { %vm1435_vm15 = vcmp.eq.s32.totalorder %v1434_v30, 1 }
0x15aa   :  { %1966 = vrot.lane.b32.xlu1 %v1964_v6, %s2889_s0 }
0x15ab   :  { %v1690_v18 = vpop.permute.xlu1 %1689 }
0x15ac   :  { %vm1691_vm0 = vcmp.eq.s32.totalorder %v1690_v18, 1 }
0x15af   :  { %v1682_v32 = vpop.permute.xlu1 %1681 }
0x15b0   :  { %v1684_v3 = vadd.f32 %v1682_v32, %v3412_v49 }
0x15b2   :  { %v1685_v1 = vmul.f32 0.5, %v1684_v3 }
0x1601   :  { %v2211_v20 = vpop.permute.xlu0 %2210 }
0x1602   :  { %v2213_v22 = vadd.f32 %v2211_v20, %v2208_v11 }
0x1604   :  { %v2214_v15 = vmul.f32 0.5, %v2213_v22 }
0x1606   :  { %v2221_v25 = vsel %vm2220_vm14, %v2214_v15, -inf }
0x1607   :  { %2223 = vrot.lane.b32.xlu0 %v2221_v25, %s2889_s0 }
0x1610   :  { %v1453_v33 = vpop.permute.xlu1 %1452 }
0x1612   :  { %v2144_v2 = vpop.permute.xlu0 %2143 }
0x1613   :  { %v2146_v27 = vmul.f32 %v2144_v2, %v2140_v36 }
0x1614   :  { %v2153_v37 = vpop.permute.xlu1 %2152 }
0x1615   :  { %v2155_v26 = vmul.f32 %v2153_v37, %v2146_v27 }
0x1616   :  { %v1426_v5 = vpop.permute.xlu0 %1425 }
0x1617   :  { %v1428_v17 = vadd.f32 %v1426_v5, %v3360_v53  ;;  %v1692_v53 = vsel %vm1691_vm0, %v1685_v1, -inf  ;;  %v2156_v34 = vadd.f32 %v2155_v26, %v3453_v24 }
0x1618   :  { %v1710_v49 = vpop.permute.xlu1 %1709 }
0x1619   :  { %v1429_v9 = vmul.f32 0.5, %v1428_v17 }
0x161a   :  { %v1947_v23 = vpop.permute.xlu0 %1946 }
0x161b   :  { %v1436_v58 = vsel %vm1435_vm15, %v1429_v9, -inf  ;;  %vm1948_vm2 = vcmp.eq.s32.totalorder %v1947_v23, 1 }
0x161c   :  { %v1455_v42 = vmax.f32 %v1436_v58, %v1453_v33  ;;  %v1967_v35 = vpop.permute.xlu1 %1966 }
0x161e   :  { %v1939_v8 = vpop.permute.xlu0 %1938  ;;  %v1693_v31 = vmax.f32 %v1455_v42, %v1692_v53 }
0x161f   :  { %v1941_v40 = vadd.f32 %v1939_v8, %v3453_v24  ;;  %v2368_v24 = vld [vmem:[%s3554_s5 + $0x2] ss:$0 sm:$0xff] }
0x1620   :  { %v1712_v48 = vmax.f32 %v1693_v31, %v1710_v49 }
0x1621   :  { %v1942_v41 = vmul.f32 0.5, %v1941_v40 }
0x1622   :  { %v2204_v38 = vpop.permute.xlu0 %2203 }
0x1623   :  { %v1949_v61 = vsel %vm1948_vm2, %v1942_v41, -inf  ;;  %vm2205_vm3 = vcmp.eq.s32.totalorder %v2204_v38, 1 }
0x1624   :  { %v1950_v39 = vmax.f32 %v1712_v48, %v1949_v61 }
0x1626   :  { %v2196_v44 = vpop.permute.xlu0 %2195  ;;  %v1969_v52 = vmax.f32 %v1950_v39, %v1967_v35 }
0x1627   :  { %v2198_v47 = vadd.f32 %v2196_v44, %v2156_v34 }
0x1629   :  { %v2199_v29 = vmul.f32 0.5, %v2198_v47 }
0x162b   :  { %v2206_v46 = vsel %vm2205_vm3, %v2199_v29, -inf }
0x162c   :  { %v2207_v55 = vmax.f32 %v1969_v52, %v2206_v46 }
0x1679   :  { %v2224_v43 = vpop.permute.xlu0 %2223 }
0x167a   :  { %v2226_v28 = vmax.f32 %v2207_v55, %v2224_v43 }
0x167c   :  { %2239 = vrot.lane.b32.xlu1 %v2226_v28, %s2887_s8 }
0x16ee   :  { %v2240_v54 = vpop.permute.xlu1 %2239 }
0x16ef   :  { %2640 = vmatmul.mubr.msk.f32.vlgmr.msra.gmra.mrb[28].mxu0 %vm64_vm1, %v2240_v54 }
0x17c2   :  { %v2309_v56 = vpop.f32.mrb[28].mxu0 }
0x17c3   :  { %v2310_v51 = vadd.f32 %v2368_v24, %v2309_v56  ;;  %v2641_v57 = vpop.f32.mrb[29].mxu0 }
0x17c5   :  { %2314 = vst.msk [vmem:[#allocation6] sm:$0xff] %vm2313_vm4, %v2310_v51 }
0x17c6   :  { %2871 = shalt.err (!%p2868_p4)
}
0x17c7   :  { %s2872_s4 = scalar_lea.hbm %s3556_s7, 128 }
0x17c8   :  { %p2873_p5 = scmp.ne.s32.totalorder %s3556_s7, %s2872_s4  ;;  %p2876_p6 = scmp.lt.u32.totalorder %s2872_s4, %s3556_s7 }
0x17ca   :  { %p2878_p7 = pnand %p2876_p6, %p2873_p5 }
0x17cc   :  { %2881 = shalt.err (!%p2878_p7)
}
0x17cd   :  { %2324 = dma.vmem_to_hbm [thread:$0]  %s2322_s12, 128, %s3556_s7, [#allocation7]  }
0x17ce   :  { %2882 = dma.done.wait [#allocation7], 128  }
0x17cf   :  { %2883 = vsyncadd [#allocation7], 4294967168 }
0x17d0   :  { %2328 = vsyncpa [#allocation7], 1 }

</bundles_post_ra>
